<compile_context>
chip_gen: v7x
topology: tpu7x:2x2x1
jax: 0.10.0
libtpu: 0.0.40
codegen_flags: <defaults>
</compile_context>

<pallas_src>
import jax
import jax.numpy as jnp
from jax.experimental import pallas as pl
from jax.experimental.pallas import tpu as pltpu

# ----------------------------- T5 config (small) -----------------------------
D_MODEL = 32
NUM_HEADS = 4
D_KV = D_MODEL // NUM_HEADS        # 8
D_FF = 64
EPS = 1e-6

BATCH = 2
SEQ = 8            # decoder seq_len
ENC_SEQ = 8        # encoder seq_len


# ------------------------------- Pallas kernel -------------------------------
def _decoder_block_kernel(
    x_ref,        # (B*S, D)       decoder hidden states (flattened)
    enc_ref,      # (B*Se, D)      encoder hidden states (flattened)
    sbias_ref,    # (B*H*S, S)     self-attn  position bias + mask (combined)
    cbias_ref,    # (B*H*S, Se)    cross-attn position bias + mask (combined)
    ln_ref,       # (3, D)         [ln1; ln2; ln3]
    wself_ref,    # (D, 4D)        [Wq | Wk | Wv | Wo]  self-attention
    wcross_ref,   # (D, 4D)        [Wq | Wk | Wv | Wo]  cross-attention
    wffi_ref,     # (D, F)
    wffo_ref,     # (F, D)
    out_ref,      # (B*S, D)
    ctx_ref,      # scratch: (B*S, D) f32  per-head context assembly buffer
):
    BS, D = x_ref.shape
    S = sbias_ref.shape[1]
    Se = cbias_ref.shape[1]
    B = BS // S
    H = sbias_ref.shape[0] // BS
    Dkv = D // H

    x = x_ref[...]        # (B*S, D)
    enc = enc_ref[...]    # (B*Se, D)

    def rmsnorm(h, w):
        # T5 LayerNorm: no mean subtraction, no bias.
        var = jnp.mean(h * h, axis=-1, keepdims=True)
        return h * jax.lax.rsqrt(var + EPS) * w

    def attention(q, kv, bias_flat, wo):
        # q:         (B*S, D)            per-head query at lane offset h*Dkv
        # kv:        (B*Sk, 2D)          [K | V] along lanes
        # bias_flat: (B*H*S, Sk)         combined position bias + additive mask
        # wo:        (D, D)
        Sk = bias_flat.shape[1]

        # --- 1. QK^T for every (batch, head), stacked along sublanes --------
        # TODO(synk): q head slices are 8-lane reads at offsets 8/16/24; if the
        # bundle dump shows lane shuffles, transpose qkv per batch so head
        # slices become sublane slices.
        kvT = []
        tiles = []
        for b in range(B):
            kvT_b = kv[b * Sk:(b + 1) * Sk, :].T            # (2D, Sk): [K^T ; V^T]
            kvT.append(kvT_b)
            for h in range(H):
                lo = h * Dkv
                qh = q[b * S:(b + 1) * S, lo:lo + Dkv]       # (S, Dkv)
                khT = kvT_b[lo:lo + Dkv, :]                  # (Dkv, Sk) sublane slice
                # T5 does NOT scale scores by 1/sqrt(d_kv).
                tiles.append(jnp.dot(qh, khT, preferred_element_type=jnp.float32))
        s = jnp.concatenate(tiles, axis=0) + bias_flat       # (B*H*S, Sk)

        # --- 2. one batched softmax over the whole stacked score slab -------
        s = s - jnp.max(s, axis=-1, keepdims=True)
        p = jnp.exp(s)
        p = p * pl.reciprocal(jnp.sum(p, axis=-1, keepdims=True), approx=True)

        # --- 3. PV per head, placed into the (B*S, D) context scratch -------
        for b in range(B):
            for h in range(H):
                lo = h * Dkv
                r = (b * H + h) * S
                vhT = kvT[b][D + lo:D + lo + Dkv, :]          # (Dkv, Sk) sublane slice
                ctx_bh = jnp.dot(p[r:r + S, :], vhT.T,
                                 preferred_element_type=jnp.float32)   # (S, Dkv)
                ctx_ref[b * S:(b + 1) * S, lo:lo + Dkv] = ctx_bh

        # --- 4. single output projection: (B*S, D) @ (D, D) -----------------
        return jnp.dot(ctx_ref[...], wo, preferred_element_type=jnp.float32)

    # ----------------------------- self-attention -----------------------------
    nx = rmsnorm(x, ln_ref[0:1, :])
    qkv = jnp.dot(nx, wself_ref[:, :3 * D], preferred_element_type=jnp.float32)   # (B*S, 3D)
    x = x + attention(qkv[:, :D], qkv[:, D:], sbias_ref[...], wself_ref[:, 3 * D:])

    # ----------------------------- cross-attention ----------------------------
    nx = rmsnorm(x, ln_ref[1:2, :])
    cq = jnp.dot(nx, wcross_ref[:, :D], preferred_element_type=jnp.float32)        # (B*S, D)
    ckv = jnp.dot(enc, wcross_ref[:, D:3 * D], preferred_element_type=jnp.float32)  # (B*Se, 2D)
    x = x + attention(cq, ckv, cbias_ref[...], wcross_ref[:, 3 * D:])

    # ---------------------- feed-forward (dense-relu-dense) -------------------
    nx = rmsnorm(x, ln_ref[2:3, :])
    hdd = jnp.maximum(
        jnp.dot(nx, wffi_ref[...], preferred_element_type=jnp.float32), 0.0)
    x = x + jnp.dot(hdd, wffo_ref[...], preferred_element_type=jnp.float32)

    out_ref[...] = x


# --------------------------------- wrapper -----------------------------------
@jax.jit
def t5_decoder_block(hidden, enc, self_mask, cross_mask, self_pb, cross_pb, params):
    """Returns (hidden_states, self_position_bias, cross_position_bias)."""
    B, S, D = hidden.shape
    Se = enc.shape[1]
    H = self_pb.shape[1]

    # One contiguous (B*S, D) activation slab.
    x2 = hidden.reshape(B * S, D)
    enc2 = enc.reshape(B * Se, D)

    # Pre-combine position bias + additive mask; flatten to match the stacked
    # (B*H*S, Sk) score layout inside the kernel (row = (b*H + h)*S + q).
    sbias = (self_pb + self_mask[:, None, :, :]).reshape(B * H * S, S)
    cbias = (cross_pb + cross_mask[:, None, :, :]).reshape(B * H * S, Se)

    # Consolidated weight slabs (fewer DMA descriptors, fused QKV / KV matmuls).
    ln_w = jnp.concatenate([params["ln1"], params["ln2"], params["ln3"]], axis=0)   # (3, D)
    w_self = jnp.concatenate(
        [params["sq"], params["sk"], params["sv"], params["so"]], axis=1)           # (D, 4D)
    w_cross = jnp.concatenate(
        [params["cq"], params["ck"], params["cv"], params["co"]], axis=1)           # (D, 4D)

    vmem = pl.BlockSpec(memory_space=pltpu.MemorySpace.VMEM)
    out = pl.pallas_call(
        _decoder_block_kernel,
        out_shape=jax.ShapeDtypeStruct((B * S, D), jnp.float32),
        in_specs=[vmem] * 9,
        out_specs=vmem,
        scratch_shapes=[pltpu.VMEM((B * S, D), jnp.float32)],
    )(x2, enc2, sbias, cbias, ln_w, w_self, w_cross, params["wi"], params["wo"])

    # The module also returns the (possibly newly created) position biases.
    return out.reshape(B, S, D), self_pb, cross_pb


# ---------------------------- pure-JAX reference ------------------------------
def reference(hidden, enc, self_mask, cross_mask, self_pb, cross_pb, p):
    def rms(x, w):
        var = jnp.mean(x * x, axis=-1, keepdims=True)
        return x * jax.lax.rsqrt(var + EPS) * w

    def attn(q_in, kv_in, wq, wk, wv, wo, pb, add_mask):
        B, Sq, D = q_in.shape
        Sk = kv_in.shape[1]
        q = (q_in @ wq).reshape(B, Sq, NUM_HEADS, D_KV).transpose(0, 2, 1, 3)
        k = (kv_in @ wk).reshape(B, Sk, NUM_HEADS, D_KV).transpose(0, 2, 1, 3)
        v = (kv_in @ wv).reshape(B, Sk, NUM_HEADS, D_KV).transpose(0, 2, 1, 3)
        scores = jnp.einsum("bhqd,bhkd->bhqk", q, k) + pb + add_mask[:, None]
        a = jax.nn.softmax(scores, axis=-1)
        ctx = jnp.einsum("bhqk,bhkd->bhqd", a, v).transpose(0, 2, 1, 3).reshape(B, Sq, D)
        return ctx @ wo

    x = hidden
    nx = rms(x, p["ln1"])
    x = x + attn(nx, nx, p["sq"], p["sk"], p["sv"], p["so"], self_pb, self_mask)
    nx = rms(x, p["ln2"])
    x = x + attn(nx, enc, p["cq"], p["ck"], p["cv"], p["co"], cross_pb, cross_mask)
    nx = rms(x, p["ln3"])
    x = x + jnp.maximum(nx @ p["wi"], 0.0) @ p["wo"]
    return x


# ----------------------------------- main -------------------------------------
if __name__ == "__main__":
    key = jax.random.PRNGKey(0)
    keys = jax.random.split(key, 16)

    D, F, H, S, Se, B = D_MODEL, D_FF, NUM_HEADS, SEQ, ENC_SEQ, BATCH

    def w(k, shape, scale=0.05):
        return (scale * jax.random.normal(k, shape)).astype(jnp.float32)

    params = {
        "ln1": jnp.ones((1, D), jnp.float32),
        "sq": w(keys[0], (D, D)), "sk": w(keys[1], (D, D)),
        "sv": w(keys[2], (D, D)), "so": w(keys[3], (D, D)),
        "ln2": jnp.ones((1, D), jnp.float32),
        "cq": w(keys[4], (D, D)), "ck": w(keys[5], (D, D)),
        "cv": w(keys[6], (D, D)), "co": w(keys[7], (D, D)),
        "ln3": jnp.ones((1, D), jnp.float32),
        "wi": w(keys[8], (D, F)), "wo": w(keys[9], (F, D)),
    }

    hidden = jax.random.normal(keys[10], (B, S, D), jnp.float32)
    enc_hidden = jax.random.normal(keys[11], (B, Se, D), jnp.float32)

    # additive masks: causal for self-attention, all-visible for cross-attention
    causal = jnp.where(
        jnp.arange(S)[:, None] >= jnp.arange(S)[None, :], 0.0, -1e9
    ).astype(jnp.float32)
    self_mask = jnp.broadcast_to(causal, (B, S, S))
    cross_mask = jnp.zeros((B, S, Se), jnp.float32)

    # position biases (would come from relative-attention-bias embedding in T5)
    self_pb = 0.1 * jax.random.normal(keys[12], (1, H, S, S), jnp.float32)
    cross_pb = jnp.zeros((1, H, S, Se), jnp.float32)  # T5 cross-attn bias is zero

    ref = reference(hidden, enc_hidden, self_mask, cross_mask, self_pb, cross_pb, params)

    out, spb, cpb = t5_decoder_block(
        hidden, enc_hidden, self_mask, cross_mask, self_pb, cross_pb, params
    )
    out = jax.block_until_ready(out)

    assert out.shape == (B, S, D)
    # slightly relaxed tolerance for the approximate EUP reciprocal in softmax
    assert jnp.allclose(out, ref, rtol=2e-3, atol=2e-3), "mismatch vs JAX reference"

    print("KERNEL_OK")
</pallas_src>

<mosaic_0001>
module attributes {stable_mosaic.version = 11 : i64} {
  func.func @_decoder_block_kernel(%arg0: memref<16x32xf32, #tpu.memory_space<vmem>>, %arg1: memref<16x32xf32, #tpu.memory_space<vmem>>, %arg2: memref<64x8xf32, #tpu.memory_space<vmem>>, %arg3: memref<64x8xf32, #tpu.memory_space<vmem>>, %arg4: memref<3x32xf32, #tpu.memory_space<vmem>>, %arg5: memref<32x128xf32, #tpu.memory_space<vmem>>, %arg6: memref<32x128xf32, #tpu.memory_space<vmem>>, %arg7: memref<32x64xf32, #tpu.memory_space<vmem>>, %arg8: memref<64x32xf32, #tpu.memory_space<vmem>>, %arg9: memref<16x32xf32, #tpu.memory_space<vmem>>, %arg10: memref<16x32xf32, #tpu.memory_space<vmem>>) attributes {dimension_semantics = [], scalar_prefetch = 0 : i64, scratch_operands = 1 : i64, tpu.core_type = #tpu.core_type<tc>} {
    %c0 = arith.constant 0 : index
    %c0_0 = arith.constant 0 : index
    %0 = vector.load %arg0[%c0, %c0_0] : memref<16x32xf32, #tpu.memory_space<vmem>>, vector<16x32xf32>
    %c0_1 = arith.constant 0 : index
    %c0_2 = arith.constant 0 : index
    %1 = vector.load %arg1[%c0_1, %c0_2] : memref<16x32xf32, #tpu.memory_space<vmem>>, vector<16x32xf32>
    %c0_3 = arith.constant 0 : index
    %c0_4 = arith.constant 0 : index
    %2 = vector.load %arg4[%c0_3, %c0_4] : memref<3x32xf32, #tpu.memory_space<vmem>>, vector<1x32xf32>
    %3 = arith.mulf %0, %0 : vector<16x32xf32>
    %cst = arith.constant dense<0.000000e+00> : vector<16xf32>
    %4 = vector.multi_reduction <add>, %3, %cst [1] : vector<16x32xf32> to vector<16xf32>
    %5 = vector.shape_cast %4 : vector<16xf32> to vector<16x1xf32>
    %cst_5 = arith.constant 3.200000e+01 : f32
    %6 = vector.broadcast %cst_5 : f32 to vector<16x1xf32>
    %7 = arith.divf %5, %6 : vector<16x1xf32>
    %cst_6 = arith.constant 9.99999997E-7 : f32
    %8 = vector.broadcast %cst_6 : f32 to vector<16x1xf32>
    %9 = arith.addf %7, %8 : vector<16x1xf32>
    %10 = math.rsqrt %9 : vector<16x1xf32>
    %11 = vector.broadcast %10 : vector<16x1xf32> to vector<16x32xf32>
    %12 = arith.mulf %0, %11 : vector<16x32xf32>
    %13 = vector.broadcast %2 : vector<1x32xf32> to vector<16x32xf32>
    %14 = arith.mulf %12, %13 : vector<16x32xf32>
    %c0_7 = arith.constant 0 : index
    %c0_8 = arith.constant 0 : index
    %15 = vector.load %arg5[%c0_7, %c0_8] : memref<32x128xf32, #tpu.memory_space<vmem>>, vector<32x96xf32>
    %cst_9 = arith.constant dense<0.000000e+00> : vector<16x96xf32>
    %16 = tpu.matmul %14, %15, %cst_9 {dimension_numbers = #tpu.dot_dimension_numbers<[1], [0], [0], [1], [0, 0, 1, 1], [], []>} : vector<16x32xf32>, vector<32x96xf32>, vector<16x96xf32> -> vector<16x96xf32>
    %17 = vector.extract_strided_slice %16 {offsets = [0, 0], sizes = [16, 32], strides = [1, 1]} : vector<16x96xf32> to vector<16x32xf32>
    %18 = vector.extract_strided_slice %16 {offsets = [0, 32], sizes = [16, 64], strides = [1, 1]} : vector<16x96xf32> to vector<16x64xf32>
    %c0_10 = arith.constant 0 : index
    %c0_11 = arith.constant 0 : index
    %19 = vector.load %arg2[%c0_10, %c0_11] : memref<64x8xf32, #tpu.memory_space<vmem>>, vector<64x8xf32>
    %c0_12 = arith.constant 0 : index
    %c96 = arith.constant 96 : index
    %20 = vector.load %arg5[%c0_12, %c96] : memref<32x128xf32, #tpu.memory_space<vmem>>, vector<32x32xf32>
    %21 = vector.extract_strided_slice %18 {offsets = [0, 0], sizes = [8, 64], strides = [1, 1]} : vector<16x64xf32> to vector<8x64xf32>
    %22 = tpu.transpose %21, [1, 0] : vector<8x64xf32> -> vector<64x8xf32>
    %23 = vector.extract_strided_slice %17 {offsets = [0, 0], sizes = [8, 8], strides = [1, 1]} : vector<16x32xf32> to vector<8x8xf32>
    %24 = vector.extract_strided_slice %22 {offsets = [0, 0], sizes = [8, 8], strides = [1, 1]} : vector<64x8xf32> to vector<8x8xf32>
    %cst_13 = arith.constant dense<0.000000e+00> : vector<8x8xf32>
    %25 = tpu.matmul %23, %24, %cst_13 {dimension_numbers = #tpu.dot_dimension_numbers<[1], [0], [0], [1], [0, 0, 1, 1], [], []>} : vector<8x8xf32>, vector<8x8xf32>, vector<8x8xf32> -> vector<8x8xf32>
    %26 = vector.extract_strided_slice %17 {offsets = [0, 8], sizes = [8, 8], strides = [1, 1]} : vector<16x32xf32> to vector<8x8xf32>
    %27 = vector.extract_strided_slice %22 {offsets = [8, 0], sizes = [8, 8], strides = [1, 1]} : vector<64x8xf32> to vector<8x8xf32>
    %cst_14 = arith.constant dense<0.000000e+00> : vector<8x8xf32>
    %28 = tpu.matmul %26, %27, %cst_14 {dimension_numbers = #tpu.dot_dimension_numbers<[1], [0], [0], [1], [0, 0, 1, 1], [], []>} : vector<8x8xf32>, vector<8x8xf32>, vector<8x8xf32> -> vector<8x8xf32>
    %29 = vector.extract_strided_slice %17 {offsets = [0, 16], sizes = [8, 8], strides = [1, 1]} : vector<16x32xf32> to vector<8x8xf32>
    %30 = vector.extract_strided_slice %22 {offsets = [16, 0], sizes = [8, 8], strides = [1, 1]} : vector<64x8xf32> to vector<8x8xf32>
    %cst_15 = arith.constant dense<0.000000e+00> : vector<8x8xf32>
    %31 = tpu.matmul %29, %30, %cst_15 {dimension_numbers = #tpu.dot_dimension_numbers<[1], [0], [0], [1], [0, 0, 1, 1], [], []>} : vector<8x8xf32>, vector<8x8xf32>, vector<8x8xf32> -> vector<8x8xf32>
    %32 = vector.extract_strided_slice %17 {offsets = [0, 24], sizes = [8, 8], strides = [1, 1]} : vector<16x32xf32> to vector<8x8xf32>
    %33 = vector.extract_strided_slice %22 {offsets = [24, 0], sizes = [8, 8], strides = [1, 1]} : vector<64x8xf32> to vector<8x8xf32>
    %cst_16 = arith.constant dense<0.000000e+00> : vector<8x8xf32>
    %34 = tpu.matmul %32, %33, %cst_16 {dimension_numbers = #tpu.dot_dimension_numbers<[1], [0], [0], [1], [0, 0, 1, 1], [], []>} : vector<8x8xf32>, vector<8x8xf32>, vector<8x8xf32> -> vector<8x8xf32>
    %35 = vector.extract_strided_slice %18 {offsets = [8, 0], sizes = [8, 64], strides = [1, 1]} : vector<16x64xf32> to vector<8x64xf32>
    %36 = tpu.transpose %35, [1, 0] : vector<8x64xf32> -> vector<64x8xf32>
    %37 = vector.extract_strided_slice %17 {offsets = [8, 0], sizes = [8, 8], strides = [1, 1]} : vector<16x32xf32> to vector<8x8xf32>
    %38 = vector.extract_strided_slice %36 {offsets = [0, 0], sizes = [8, 8], strides = [1, 1]} : vector<64x8xf32> to vector<8x8xf32>
    %cst_17 = arith.constant dense<0.000000e+00> : vector<8x8xf32>
    %39 = tpu.matmul %37, %38, %cst_17 {dimension_numbers = #tpu.dot_dimension_numbers<[1], [0], [0], [1], [0, 0, 1, 1], [], []>} : vector<8x8xf32>, vector<8x8xf32>, vector<8x8xf32> -> vector<8x8xf32>
    %40 = vector.extract_strided_slice %17 {offsets = [8, 8], sizes = [8, 8], strides = [1, 1]} : vector<16x32xf32> to vector<8x8xf32>
    %41 = vector.extract_strided_slice %36 {offsets = [8, 0], sizes = [8, 8], strides = [1, 1]} : vector<64x8xf32> to vector<8x8xf32>
    %cst_18 = arith.constant dense<0.000000e+00> : vector<8x8xf32>
    %42 = tpu.matmul %40, %41, %cst_18 {dimension_numbers = #tpu.dot_dimension_numbers<[1], [0], [0], [1], [0, 0, 1, 1], [], []>} : vector<8x8xf32>, vector<8x8xf32>, vector<8x8xf32> -> vector<8x8xf32>
    %43 = vector.extract_strided_slice %17 {offsets = [8, 16], sizes = [8, 8], strides = [1, 1]} : vector<16x32xf32> to vector<8x8xf32>
    %44 = vector.extract_strided_slice %36 {offsets = [16, 0], sizes = [8, 8], strides = [1, 1]} : vector<64x8xf32> to vector<8x8xf32>
    %cst_19 = arith.constant dense<0.000000e+00> : vector<8x8xf32>
    %45 = tpu.matmul %43, %44, %cst_19 {dimension_numbers = #tpu.dot_dimension_numbers<[1], [0], [0], [1], [0, 0, 1, 1], [], []>} : vector<8x8xf32>, vector<8x8xf32>, vector<8x8xf32> -> vector<8x8xf32>
    %46 = vector.extract_strided_slice %17 {offsets = [8, 24], sizes = [8, 8], strides = [1, 1]} : vector<16x32xf32> to vector<8x8xf32>
    %47 = vector.extract_strided_slice %36 {offsets = [24, 0], sizes = [8, 8], strides = [1, 1]} : vector<64x8xf32> to vector<8x8xf32>
    %cst_20 = arith.constant dense<0.000000e+00> : vector<8x8xf32>
    %48 = tpu.matmul %46, %47, %cst_20 {dimension_numbers = #tpu.dot_dimension_numbers<[1], [0], [0], [1], [0, 0, 1, 1], [], []>} : vector<8x8xf32>, vector<8x8xf32>, vector<8x8xf32> -> vector<8x8xf32>
    %49 = tpu.concatenate %25, %28, %31, %34, %39, %42, %45, %48 in 0 : vector<8x8xf32>, vector<8x8xf32>, vector<8x8xf32>, vector<8x8xf32>, vector<8x8xf32>, vector<8x8xf32>, vector<8x8xf32>, vector<8x8xf32> -> vector<64x8xf32>
    %50 = arith.addf %49, %19 : vector<64x8xf32>
    %cst_21 = arith.constant dense<0xFF800000> : vector<64xf32>
    %51 = vector.multi_reduction <maximumf>, %50, %cst_21 [1] : vector<64x8xf32> to vector<64xf32>
    %52 = vector.shape_cast %51 : vector<64xf32> to vector<64x1xf32>
    %53 = vector.broadcast %52 : vector<64x1xf32> to vector<64x8xf32>
    %54 = arith.subf %50, %53 : vector<64x8xf32>
    %55 = math.exp %54 : vector<64x8xf32>
    %cst_22 = arith.constant dense<0.000000e+00> : vector<64xf32>
    %56 = vector.multi_reduction <add>, %55, %cst_22 [1] : vector<64x8xf32> to vector<64xf32>
    %57 = vector.shape_cast %56 : vector<64xf32> to vector<64x1xf32>
    %58 = tpu.reciprocal %57 {approx = true} : vector<64x1xf32> -> vector<64x1xf32>
    %59 = vector.broadcast %58 : vector<64x1xf32> to vector<64x8xf32>
    %60 = arith.mulf %55, %59 : vector<64x8xf32>
    %61 = vector.extract_strided_slice %22 {offsets = [32, 0], sizes = [8, 8], strides = [1, 1]} : vector<64x8xf32> to vector<8x8xf32>
    %62 = vector.extract_strided_slice %60 {offsets = [0, 0], sizes = [8, 8], strides = [1, 1]} : vector<64x8xf32> to vector<8x8xf32>
    %63 = tpu.transpose %61, [1, 0] : vector<8x8xf32> -> vector<8x8xf32>
    %cst_23 = arith.constant dense<0.000000e+00> : vector<8x8xf32>
    %64 = tpu.matmul %62, %63, %cst_23 {dimension_numbers = #tpu.dot_dimension_numbers<[1], [0], [0], [1], [0, 0, 1, 1], [], []>} : vector<8x8xf32>, vector<8x8xf32>, vector<8x8xf32> -> vector<8x8xf32>
    %c0_24 = arith.constant 0 : index
    %c0_25 = arith.constant 0 : index
    %65 = vector.load %arg10[%c0_24, %c0_25] : memref<16x32xf32, #tpu.memory_space<vmem>>, vector<8x8xf32>
    tpu.vector_store %arg10[%c0_24, %c0_25], %64 {strides = array<i32>} : memref<16x32xf32, #tpu.memory_space<vmem>>, vector<8x8xf32>,
    %66 = vector.extract_strided_slice %22 {offsets = [40, 0], sizes = [8, 8], strides = [1, 1]} : vector<64x8xf32> to vector<8x8xf32>
    %67 = vector.extract_strided_slice %60 {offsets = [8, 0], sizes = [8, 8], strides = [1, 1]} : vector<64x8xf32> to vector<8x8xf32>
    %68 = tpu.transpose %66, [1, 0] : vector<8x8xf32> -> vector<8x8xf32>
    %cst_26 = arith.constant dense<0.000000e+00> : vector<8x8xf32>
    %69 = tpu.matmul %67, %68, %cst_26 {dimension_numbers = #tpu.dot_dimension_numbers<[1], [0], [0], [1], [0, 0, 1, 1], [], []>} : vector<8x8xf32>, vector<8x8xf32>, vector<8x8xf32> -> vector<8x8xf32>
    %c0_27 = arith.constant 0 : index
    %c8 = arith.constant 8 : index
    %70 = vector.load %arg10[%c0_27, %c8] : memref<16x32xf32, #tpu.memory_space<vmem>>, vector<8x8xf32>
    tpu.vector_store %arg10[%c0_27, %c8], %69 {strides = array<i32>} : memref<16x32xf32, #tpu.memory_space<vmem>>, vector<8x8xf32>,
    %71 = vector.extract_strided_slice %22 {offsets = [48, 0], sizes = [8, 8], strides = [1, 1]} : vector<64x8xf32> to vector<8x8xf32>
    %72 = vector.extract_strided_slice %60 {offsets = [16, 0], sizes = [8, 8], strides = [1, 1]} : vector<64x8xf32> to vector<8x8xf32>
    %73 = tpu.transpose %71, [1, 0] : vector<8x8xf32> -> vector<8x8xf32>
    %cst_28 = arith.constant dense<0.000000e+00> : vector<8x8xf32>
    %74 = tpu.matmul %72, %73, %cst_28 {dimension_numbers = #tpu.dot_dimension_numbers<[1], [0], [0], [1], [0, 0, 1, 1], [], []>} : vector<8x8xf32>, vector<8x8xf32>, vector<8x8xf32> -> vector<8x8xf32>
    %c0_29 = arith.constant 0 : index
    %c16 = arith.constant 16 : index
    %75 = vector.load %arg10[%c0_29, %c16] : memref<16x32xf32, #tpu.memory_space<vmem>>, vector<8x8xf32>
    tpu.vector_store %arg10[%c0_29, %c16], %74 {strides = array<i32>} : memref<16x32xf32, #tpu.memory_space<vmem>>, vector<8x8xf32>,
    %76 = vector.extract_strided_slice %22 {offsets = [56, 0], sizes = [8, 8], strides = [1, 1]} : vector<64x8xf32> to vector<8x8xf32>
    %77 = vector.extract_strided_slice %60 {offsets = [24, 0], sizes = [8, 8], strides = [1, 1]} : vector<64x8xf32> to vector<8x8xf32>
    %78 = tpu.transpose %76, [1, 0] : vector<8x8xf32> -> vector<8x8xf32>
    %cst_30 = arith.constant dense<0.000000e+00> : vector<8x8xf32>
    %79 = tpu.matmul %77, %78, %cst_30 {dimension_numbers = #tpu.dot_dimension_numbers<[1], [0], [0], [1], [0, 0, 1, 1], [], []>} : vector<8x8xf32>, vector<8x8xf32>, vector<8x8xf32> -> vector<8x8xf32>
    %c0_31 = arith.constant 0 : index
    %c24 = arith.constant 24 : index
    %80 = vector.load %arg10[%c0_31, %c24] : memref<16x32xf32, #tpu.memory_space<vmem>>, vector<8x8xf32>
    tpu.vector_store %arg10[%c0_31, %c24], %79 {strides = array<i32>} : memref<16x32xf32, #tpu.memory_space<vmem>>, vector<8x8xf32>,
    %81 = vector.extract_strided_slice %36 {offsets = [32, 0], sizes = [8, 8], strides = [1, 1]} : vector<64x8xf32> to vector<8x8xf32>
    %82 = vector.extract_strided_slice %60 {offsets = [32, 0], sizes = [8, 8], strides = [1, 1]} : vector<64x8xf32> to vector<8x8xf32>
    %83 = tpu.transpose %81, [1, 0] : vector<8x8xf32> -> vector<8x8xf32>
    %cst_32 = arith.constant dense<0.000000e+00> : vector<8x8xf32>
    %84 = tpu.matmul %82, %83, %cst_32 {dimension_numbers = #tpu.dot_dimension_numbers<[1], [0], [0], [1], [0, 0, 1, 1], [], []>} : vector<8x8xf32>, vector<8x8xf32>, vector<8x8xf32> -> vector<8x8xf32>
    %c8_33 = arith.constant 8 : index
    %c0_34 = arith.constant 0 : index
    %85 = vector.load %arg10[%c8_33, %c0_34] : memref<16x32xf32, #tpu.memory_space<vmem>>, vector<8x8xf32>
    tpu.vector_store %arg10[%c8_33, %c0_34], %84 {strides = array<i32>} : memref<16x32xf32, #tpu.memory_space<vmem>>, vector<8x8xf32>,
    %86 = vector.extract_strided_slice %36 {offsets = [40, 0], sizes = [8, 8], strides = [1, 1]} : vector<64x8xf32> to vector<8x8xf32>
    %87 = vector.extract_strided_slice %60 {offsets = [40, 0], sizes = [8, 8], strides = [1, 1]} : vector<64x8xf32> to vector<8x8xf32>
    %88 = tpu.transpose %86, [1, 0] : vector<8x8xf32> -> vector<8x8xf32>
    %cst_35 = arith.constant dense<0.000000e+00> : vector<8x8xf32>
    %89 = tpu.matmul %87, %88, %cst_35 {dimension_numbers = #tpu.dot_dimension_numbers<[1], [0], [0], [1], [0, 0, 1, 1], [], []>} : vector<8x8xf32>, vector<8x8xf32>, vector<8x8xf32> -> vector<8x8xf32>
    %c8_36 = arith.constant 8 : index
    %c8_37 = arith.constant 8 : index
    %90 = vector.load %arg10[%c8_36, %c8_37] : memref<16x32xf32, #tpu.memory_space<vmem>>, vector<8x8xf32>
    tpu.vector_store %arg10[%c8_36, %c8_37], %89 {strides = array<i32>} : memref<16x32xf32, #tpu.memory_space<vmem>>, vector<8x8xf32>,
    %91 = vector.extract_strided_slice %36 {offsets = [48, 0], sizes = [8, 8], strides = [1, 1]} : vector<64x8xf32> to vector<8x8xf32>
    %92 = vector.extract_strided_slice %60 {offsets = [48, 0], sizes = [8, 8], strides = [1, 1]} : vector<64x8xf32> to vector<8x8xf32>
    %93 = tpu.transpose %91, [1, 0] : vector<8x8xf32> -> vector<8x8xf32>
    %cst_38 = arith.constant dense<0.000000e+00> : vector<8x8xf32>
    %94 = tpu.matmul %92, %93, %cst_38 {dimension_numbers = #tpu.dot_dimension_numbers<[1], [0], [0], [1], [0, 0, 1, 1], [], []>} : vector<8x8xf32>, vector<8x8xf32>, vector<8x8xf32> -> vector<8x8xf32>
    %c8_39 = arith.constant 8 : index
    %c16_40 = arith.constant 16 : index
    %95 = vector.load %arg10[%c8_39, %c16_40] : memref<16x32xf32, #tpu.memory_space<vmem>>, vector<8x8xf32>
    tpu.vector_store %arg10[%c8_39, %c16_40], %94 {strides = array<i32>} : memref<16x32xf32, #tpu.memory_space<vmem>>, vector<8x8xf32>,
    %96 = vector.extract_strided_slice %36 {offsets = [56, 0], sizes = [8, 8], strides = [1, 1]} : vector<64x8xf32> to vector<8x8xf32>
    %97 = vector.extract_strided_slice %60 {offsets = [56, 0], sizes = [8, 8], strides = [1, 1]} : vector<64x8xf32> to vector<8x8xf32>
    %98 = tpu.transpose %96, [1, 0] : vector<8x8xf32> -> vector<8x8xf32>
    %cst_41 = arith.constant dense<0.000000e+00> : vector<8x8xf32>
    %99 = tpu.matmul %97, %98, %cst_41 {dimension_numbers = #tpu.dot_dimension_numbers<[1], [0], [0], [1], [0, 0, 1, 1], [], []>} : vector<8x8xf32>, vector<8x8xf32>, vector<8x8xf32> -> vector<8x8xf32>
    %c8_42 = arith.constant 8 : index
    %c24_43 = arith.constant 24 : index
    %100 = vector.load %arg10[%c8_42, %c24_43] : memref<16x32xf32, #tpu.memory_space<vmem>>, vector<8x8xf32>
    tpu.vector_store %arg10[%c8_42, %c24_43], %99 {strides = array<i32>} : memref<16x32xf32, #tpu.memory_space<vmem>>, vector<8x8xf32>,
    %c0_44 = arith.constant 0 : index
    %c0_45 = arith.constant 0 : index
    %101 = vector.load %arg10[%c0_44, %c0_45] : memref<16x32xf32, #tpu.memory_space<vmem>>, vector<16x32xf32>
    %cst_46 = arith.constant dense<0.000000e+00> : vector<16x32xf32>
    %102 = tpu.matmul %101, %20, %cst_46 {dimension_numbers = #tpu.dot_dimension_numbers<[1], [0], [0], [1], [0, 0, 1, 1], [], []>} : vector<16x32xf32>, vector<32x32xf32>, vector<16x32xf32> -> vector<16x32xf32>
    %103 = arith.addf %0, %102 : vector<16x32xf32>
    %c1 = arith.constant 1 : index
    %c0_47 = arith.constant 0 : index
    %104 = vector.load %arg4[%c1, %c0_47] : memref<3x32xf32, #tpu.memory_space<vmem>>, vector<1x32xf32>
    %105 = arith.mulf %103, %103 : vector<16x32xf32>
    %cst_48 = arith.constant dense<0.000000e+00> : vector<16xf32>
    %106 = vector.multi_reduction <add>, %105, %cst_48 [1] : vector<16x32xf32> to vector<16xf32>
    %107 = vector.shape_cast %106 : vector<16xf32> to vector<16x1xf32>
    %cst_49 = arith.constant 3.200000e+01 : f32
    %108 = vector.broadcast %cst_49 : f32 to vector<16x1xf32>
    %109 = arith.divf %107, %108 : vector<16x1xf32>
    %cst_50 = arith.constant 9.99999997E-7 : f32
    %110 = vector.broadcast %cst_50 : f32 to vector<16x1xf32>
    %111 = arith.addf %109, %110 : vector<16x1xf32>
    %112 = math.rsqrt %111 : vector<16x1xf32>
    %113 = vector.broadcast %112 : vector<16x1xf32> to vector<16x32xf32>
    %114 = arith.mulf %103, %113 : vector<16x32xf32>
    %115 = vector.broadcast %104 : vector<1x32xf32> to vector<16x32xf32>
    %116 = arith.mulf %114, %115 : vector<16x32xf32>
    %c0_51 = arith.constant 0 : index
    %c0_52 = arith.constant 0 : index
    %117 = vector.load %arg6[%c0_51, %c0_52] : memref<32x128xf32, #tpu.memory_space<vmem>>, vector<32x32xf32>
    %cst_53 = arith.constant dense<0.000000e+00> : vector<16x32xf32>
    %118 = tpu.matmul %116, %117, %cst_53 {dimension_numbers = #tpu.dot_dimension_numbers<[1], [0], [0], [1], [0, 0, 1, 1], [], []>} : vector<16x32xf32>, vector<32x32xf32>, vector<16x32xf32> -> vector<16x32xf32>
    %c0_54 = arith.constant 0 : index
    %c32 = arith.constant 32 : index
    %119 = vector.load %arg6[%c0_54, %c32] : memref<32x128xf32, #tpu.memory_space<vmem>>, vector<32x64xf32>
    %cst_55 = arith.constant dense<0.000000e+00> : vector<16x64xf32>
    %120 = tpu.matmul %1, %119, %cst_55 {dimension_numbers = #tpu.dot_dimension_numbers<[1], [0], [0], [1], [0, 0, 1, 1], [], []>} : vector<16x32xf32>, vector<32x64xf32>, vector<16x64xf32> -> vector<16x64xf32>
    %c0_56 = arith.constant 0 : index
    %c0_57 = arith.constant 0 : index
    %121 = vector.load %arg3[%c0_56, %c0_57] : memref<64x8xf32, #tpu.memory_space<vmem>>, vector<64x8xf32>
    %c0_58 = arith.constant 0 : index
    %c96_59 = arith.constant 96 : index
    %122 = vector.load %arg6[%c0_58, %c96_59] : memref<32x128xf32, #tpu.memory_space<vmem>>, vector<32x32xf32>
    %123 = vector.extract_strided_slice %120 {offsets = [0, 0], sizes = [8, 64], strides = [1, 1]} : vector<16x64xf32> to vector<8x64xf32>
    %124 = tpu.transpose %123, [1, 0] : vector<8x64xf32> -> vector<64x8xf32>
    %125 = vector.extract_strided_slice %118 {offsets = [0, 0], sizes = [8, 8], strides = [1, 1]} : vector<16x32xf32> to vector<8x8xf32>
    %126 = vector.extract_strided_slice %124 {offsets = [0, 0], sizes = [8, 8], strides = [1, 1]} : vector<64x8xf32> to vector<8x8xf32>
    %cst_60 = arith.constant dense<0.000000e+00> : vector<8x8xf32>
    %127 = tpu.matmul %125, %126, %cst_60 {dimension_numbers = #tpu.dot_dimension_numbers<[1], [0], [0], [1], [0, 0, 1, 1], [], []>} : vector<8x8xf32>, vector<8x8xf32>, vector<8x8xf32> -> vector<8x8xf32>
    %128 = vector.extract_strided_slice %118 {offsets = [0, 8], sizes = [8, 8], strides = [1, 1]} : vector<16x32xf32> to vector<8x8xf32>
    %129 = vector.extract_strided_slice %124 {offsets = [8, 0], sizes = [8, 8], strides = [1, 1]} : vector<64x8xf32> to vector<8x8xf32>
    %cst_61 = arith.constant dense<0.000000e+00> : vector<8x8xf32>
    %130 = tpu.matmul %128, %129, %cst_61 {dimension_numbers = #tpu.dot_dimension_numbers<[1], [0], [0], [1], [0, 0, 1, 1], [], []>} : vector<8x8xf32>, vector<8x8xf32>, vector<8x8xf32> -> vector<8x8xf32>
    %131 = vector.extract_strided_slice %118 {offsets = [0, 16], sizes = [8, 8], strides = [1, 1]} : vector<16x32xf32> to vector<8x8xf32>
    %132 = vector.extract_strided_slice %124 {offsets = [16, 0], sizes = [8, 8], strides = [1, 1]} : vector<64x8xf32> to vector<8x8xf32>
    %cst_62 = arith.constant dense<0.000000e+00> : vector<8x8xf32>
    %133 = tpu.matmul %131, %132, %cst_62 {dimension_numbers = #tpu.dot_dimension_numbers<[1], [0], [0], [1], [0, 0, 1, 1], [], []>} : vector<8x8xf32>, vector<8x8xf32>, vector<8x8xf32> -> vector<8x8xf32>
    %134 = vector.extract_strided_slice %118 {offsets = [0, 24], sizes = [8, 8], strides = [1, 1]} : vector<16x32xf32> to vector<8x8xf32>
    %135 = vector.extract_strided_slice %124 {offsets = [24, 0], sizes = [8, 8], strides = [1, 1]} : vector<64x8xf32> to vector<8x8xf32>
    %cst_63 = arith.constant dense<0.000000e+00> : vector<8x8xf32>
    %136 = tpu.matmul %134, %135, %cst_63 {dimension_numbers = #tpu.dot_dimension_numbers<[1], [0], [0], [1], [0, 0, 1, 1], [], []>} : vector<8x8xf32>, vector<8x8xf32>, vector<8x8xf32> -> vector<8x8xf32>
    %137 = vector.extract_strided_slice %120 {offsets = [8, 0], sizes = [8, 64], strides = [1, 1]} : vector<16x64xf32> to vector<8x64xf32>
    %138 = tpu.transpose %137, [1, 0] : vector<8x64xf32> -> vector<64x8xf32>
    %139 = vector.extract_strided_slice %118 {offsets = [8, 0], sizes = [8, 8], strides = [1, 1]} : vector<16x32xf32> to vector<8x8xf32>
    %140 = vector.extract_strided_slice %138 {offsets = [0, 0], sizes = [8, 8], strides = [1, 1]} : vector<64x8xf32> to vector<8x8xf32>
    %cst_64 = arith.constant dense<0.000000e+00> : vector<8x8xf32>
    %141 = tpu.matmul %139, %140, %cst_64 {dimension_numbers = #tpu.dot_dimension_numbers<[1], [0], [0], [1], [0, 0, 1, 1], [], []>} : vector<8x8xf32>, vector<8x8xf32>, vector<8x8xf32> -> vector<8x8xf32>
    %142 = vector.extract_strided_slice %118 {offsets = [8, 8], sizes = [8, 8], strides = [1, 1]} : vector<16x32xf32> to vector<8x8xf32>
    %143 = vector.extract_strided_slice %138 {offsets = [8, 0], sizes = [8, 8], strides = [1, 1]} : vector<64x8xf32> to vector<8x8xf32>
    %cst_65 = arith.constant dense<0.000000e+00> : vector<8x8xf32>
    %144 = tpu.matmul %142, %143, %cst_65 {dimension_numbers = #tpu.dot_dimension_numbers<[1], [0], [0], [1], [0, 0, 1, 1], [], []>} : vector<8x8xf32>, vector<8x8xf32>, vector<8x8xf32> -> vector<8x8xf32>
    %145 = vector.extract_strided_slice %118 {offsets = [8, 16], sizes = [8, 8], strides = [1, 1]} : vector<16x32xf32> to vector<8x8xf32>
    %146 = vector.extract_strided_slice %138 {offsets = [16, 0], sizes = [8, 8], strides = [1, 1]} : vector<64x8xf32> to vector<8x8xf32>
    %cst_66 = arith.constant dense<0.000000e+00> : vector<8x8xf32>
    %147 = tpu.matmul %145, %146, %cst_66 {dimension_numbers = #tpu.dot_dimension_numbers<[1], [0], [0], [1], [0, 0, 1, 1], [], []>} : vector<8x8xf32>, vector<8x8xf32>, vector<8x8xf32> -> vector<8x8xf32>
    %148 = vector.extract_strided_slice %118 {offsets = [8, 24], sizes = [8, 8], strides = [1, 1]} : vector<16x32xf32> to vector<8x8xf32>
    %149 = vector.extract_strided_slice %138 {offsets = [24, 0], sizes = [8, 8], strides = [1, 1]} : vector<64x8xf32> to vector<8x8xf32>
    %cst_67 = arith.constant dense<0.000000e+00> : vector<8x8xf32>
    %150 = tpu.matmul %148, %149, %cst_67 {dimension_numbers = #tpu.dot_dimension_numbers<[1], [0], [0], [1], [0, 0, 1, 1], [], []>} : vector<8x8xf32>, vector<8x8xf32>, vector<8x8xf32> -> vector<8x8xf32>
    %151 = tpu.concatenate %127, %130, %133, %136, %141, %144, %147, %150 in 0 : vector<8x8xf32>, vector<8x8xf32>, vector<8x8xf32>, vector<8x8xf32>, vector<8x8xf32>, vector<8x8xf32>, vector<8x8xf32>, vector<8x8xf32> -> vector<64x8xf32>
    %152 = arith.addf %151, %121 : vector<64x8xf32>
    %cst_68 = arith.constant dense<0xFF800000> : vector<64xf32>
    %153 = vector.multi_reduction <maximumf>, %152, %cst_68 [1] : vector<64x8xf32> to vector<64xf32>
    %154 = vector.shape_cast %153 : vector<64xf32> to vector<64x1xf32>
    %155 = vector.broadcast %154 : vector<64x1xf32> to vector<64x8xf32>
    %156 = arith.subf %152, %155 : vector<64x8xf32>
    %157 = math.exp %156 : vector<64x8xf32>
    %cst_69 = arith.constant dense<0.000000e+00> : vector<64xf32>
    %158 = vector.multi_reduction <add>, %157, %cst_69 [1] : vector<64x8xf32> to vector<64xf32>
    %159 = vector.shape_cast %158 : vector<64xf32> to vector<64x1xf32>
    %160 = tpu.reciprocal %159 {approx = true} : vector<64x1xf32> -> vector<64x1xf32>
    %161 = vector.broadcast %160 : vector<64x1xf32> to vector<64x8xf32>
    %162 = arith.mulf %157, %161 : vector<64x8xf32>
    %163 = vector.extract_strided_slice %124 {offsets = [32, 0], sizes = [8, 8], strides = [1, 1]} : vector<64x8xf32> to vector<8x8xf32>
    %164 = vector.extract_strided_slice %162 {offsets = [0, 0], sizes = [8, 8], strides = [1, 1]} : vector<64x8xf32> to vector<8x8xf32>
    %165 = tpu.transpose %163, [1, 0] : vector<8x8xf32> -> vector<8x8xf32>
    %cst_70 = arith.constant dense<0.000000e+00> : vector<8x8xf32>
    %166 = tpu.matmul %164, %165, %cst_70 {dimension_numbers = #tpu.dot_dimension_numbers<[1], [0], [0], [1], [0, 0, 1, 1], [], []>} : vector<8x8xf32>, vector<8x8xf32>, vector<8x8xf32> -> vector<8x8xf32>
    %c0_71 = arith.constant 0 : index
    %c0_72 = arith.constant 0 : index
    %167 = vector.load %arg10[%c0_71, %c0_72] : memref<16x32xf32, #tpu.memory_space<vmem>>, vector<8x8xf32>
    tpu.vector_store %arg10[%c0_71, %c0_72], %166 {strides = array<i32>} : memref<16x32xf32, #tpu.memory_space<vmem>>, vector<8x8xf32>,
    %168 = vector.extract_strided_slice %124 {offsets = [40, 0], sizes = [8, 8], strides = [1, 1]} : vector<64x8xf32> to vector<8x8xf32>
    %169 = vector.extract_strided_slice %162 {offsets = [8, 0], sizes = [8, 8], strides = [1, 1]} : vector<64x8xf32> to vector<8x8xf32>
    %170 = tpu.transpose %168, [1, 0] : vector<8x8xf32> -> vector<8x8xf32>
    %cst_73 = arith.constant dense<0.000000e+00> : vector<8x8xf32>
    %171 = tpu.matmul %169, %170, %cst_73 {dimension_numbers = #tpu.dot_dimension_numbers<[1], [0], [0], [1], [0, 0, 1, 1], [], []>} : vector<8x8xf32>, vector<8x8xf32>, vector<8x8xf32> -> vector<8x8xf32>
    %c0_74 = arith.constant 0 : index
    %c8_75 = arith.constant 8 : index
    %172 = vector.load %arg10[%c0_74, %c8_75] : memref<16x32xf32, #tpu.memory_space<vmem>>, vector<8x8xf32>
    tpu.vector_store %arg10[%c0_74, %c8_75], %171 {strides = array<i32>} : memref<16x32xf32, #tpu.memory_space<vmem>>, vector<8x8xf32>,
    %173 = vector.extract_strided_slice %124 {offsets = [48, 0], sizes = [8, 8], strides = [1, 1]} : vector<64x8xf32> to vector<8x8xf32>
    %174 = vector.extract_strided_slice %162 {offsets = [16, 0], sizes = [8, 8], strides = [1, 1]} : vector<64x8xf32> to vector<8x8xf32>
    %175 = tpu.transpose %173, [1, 0] : vector<8x8xf32> -> vector<8x8xf32>
    %cst_76 = arith.constant dense<0.000000e+00> : vector<8x8xf32>
    %176 = tpu.matmul %174, %175, %cst_76 {dimension_numbers = #tpu.dot_dimension_numbers<[1], [0], [0], [1], [0, 0, 1, 1], [], []>} : vector<8x8xf32>, vector<8x8xf32>, vector<8x8xf32> -> vector<8x8xf32>
    %c0_77 = arith.constant 0 : index
    %c16_78 = arith.constant 16 : index
    %177 = vector.load %arg10[%c0_77, %c16_78] : memref<16x32xf32, #tpu.memory_space<vmem>>, vector<8x8xf32>
    tpu.vector_store %arg10[%c0_77, %c16_78], %176 {strides = array<i32>} : memref<16x32xf32, #tpu.memory_space<vmem>>, vector<8x8xf32>,
    %178 = vector.extract_strided_slice %124 {offsets = [56, 0], sizes = [8, 8], strides = [1, 1]} : vector<64x8xf32> to vector<8x8xf32>
    %179 = vector.extract_strided_slice %162 {offsets = [24, 0], sizes = [8, 8], strides = [1, 1]} : vector<64x8xf32> to vector<8x8xf32>
    %180 = tpu.transpose %178, [1, 0] : vector<8x8xf32> -> vector<8x8xf32>
    %cst_79 = arith.constant dense<0.000000e+00> : vector<8x8xf32>
    %181 = tpu.matmul %179, %180, %cst_79 {dimension_numbers = #tpu.dot_dimension_numbers<[1], [0], [0], [1], [0, 0, 1, 1], [], []>} : vector<8x8xf32>, vector<8x8xf32>, vector<8x8xf32> -> vector<8x8xf32>
    %c0_80 = arith.constant 0 : index
    %c24_81 = arith.constant 24 : index
    %182 = vector.load %arg10[%c0_80, %c24_81] : memref<16x32xf32, #tpu.memory_space<vmem>>, vector<8x8xf32>
    tpu.vector_store %arg10[%c0_80, %c24_81], %181 {strides = array<i32>} : memref<16x32xf32, #tpu.memory_space<vmem>>, vector<8x8xf32>,
    %183 = vector.extract_strided_slice %138 {offsets = [32, 0], sizes = [8, 8], strides = [1, 1]} : vector<64x8xf32> to vector<8x8xf32>
    %184 = vector.extract_strided_slice %162 {offsets = [32, 0], sizes = [8, 8], strides = [1, 1]} : vector<64x8xf32> to vector<8x8xf32>
    %185 = tpu.transpose %183, [1, 0] : vector<8x8xf32> -> vector<8x8xf32>
    %cst_82 = arith.constant dense<0.000000e+00> : vector<8x8xf32>
    %186 = tpu.matmul %184, %185, %cst_82 {dimension_numbers = #tpu.dot_dimension_numbers<[1], [0], [0], [1], [0, 0, 1, 1], [], []>} : vector<8x8xf32>, vector<8x8xf32>, vector<8x8xf32> -> vector<8x8xf32>
    %c8_83 = arith.constant 8 : index
    %c0_84 = arith.constant 0 : index
    %187 = vector.load %arg10[%c8_83, %c0_84] : memref<16x32xf32, #tpu.memory_space<vmem>>, vector<8x8xf32>
    tpu.vector_store %arg10[%c8_83, %c0_84], %186 {strides = array<i32>} : memref<16x32xf32, #tpu.memory_space<vmem>>, vector<8x8xf32>,
    %188 = vector.extract_strided_slice %138 {offsets = [40, 0], sizes = [8, 8], strides = [1, 1]} : vector<64x8xf32> to vector<8x8xf32>
    %189 = vector.extract_strided_slice %162 {offsets = [40, 0], sizes = [8, 8], strides = [1, 1]} : vector<64x8xf32> to vector<8x8xf32>
    %190 = tpu.transpose %188, [1, 0] : vector<8x8xf32> -> vector<8x8xf32>
    %cst_85 = arith.constant dense<0.000000e+00> : vector<8x8xf32>
    %191 = tpu.matmul %189, %190, %cst_85 {dimension_numbers = #tpu.dot_dimension_numbers<[1], [0], [0], [1], [0, 0, 1, 1], [], []>} : vector<8x8xf32>, vector<8x8xf32>, vector<8x8xf32> -> vector<8x8xf32>
    %c8_86 = arith.constant 8 : index
    %c8_87 = arith.constant 8 : index
    %192 = vector.load %arg10[%c8_86, %c8_87] : memref<16x32xf32, #tpu.memory_space<vmem>>, vector<8x8xf32>
    tpu.vector_store %arg10[%c8_86, %c8_87], %191 {strides = array<i32>} : memref<16x32xf32, #tpu.memory_space<vmem>>, vector<8x8xf32>,
    %193 = vector.extract_strided_slice %138 {offsets = [48, 0], sizes = [8, 8], strides = [1, 1]} : vector<64x8xf32> to vector<8x8xf32>
    %194 = vector.extract_strided_slice %162 {offsets = [48, 0], sizes = [8, 8], strides = [1, 1]} : vector<64x8xf32> to vector<8x8xf32>
    %195 = tpu.transpose %193, [1, 0] : vector<8x8xf32> -> vector<8x8xf32>
    %cst_88 = arith.constant dense<0.000000e+00> : vector<8x8xf32>
    %196 = tpu.matmul %194, %195, %cst_88 {dimension_numbers = #tpu.dot_dimension_numbers<[1], [0], [0], [1], [0, 0, 1, 1], [], []>} : vector<8x8xf32>, vector<8x8xf32>, vector<8x8xf32> -> vector<8x8xf32>
    %c8_89 = arith.constant 8 : index
    %c16_90 = arith.constant 16 : index
    %197 = vector.load %arg10[%c8_89, %c16_90] : memref<16x32xf32, #tpu.memory_space<vmem>>, vector<8x8xf32>
    tpu.vector_store %arg10[%c8_89, %c16_90], %196 {strides = array<i32>} : memref<16x32xf32, #tpu.memory_space<vmem>>, vector<8x8xf32>,
    %198 = vector.extract_strided_slice %138 {offsets = [56, 0], sizes = [8, 8], strides = [1, 1]} : vector<64x8xf32> to vector<8x8xf32>
    %199 = vector.extract_strided_slice %162 {offsets = [56, 0], sizes = [8, 8], strides = [1, 1]} : vector<64x8xf32> to vector<8x8xf32>
    %200 = tpu.transpose %198, [1, 0] : vector<8x8xf32> -> vector<8x8xf32>
    %cst_91 = arith.constant dense<0.000000e+00> : vector<8x8xf32>
    %201 = tpu.matmul %199, %200, %cst_91 {dimension_numbers = #tpu.dot_dimension_numbers<[1], [0], [0], [1], [0, 0, 1, 1], [], []>} : vector<8x8xf32>, vector<8x8xf32>, vector<8x8xf32> -> vector<8x8xf32>
    %c8_92 = arith.constant 8 : index
    %c24_93 = arith.constant 24 : index
    %202 = vector.load %arg10[%c8_92, %c24_93] : memref<16x32xf32, #tpu.memory_space<vmem>>, vector<8x8xf32>
    tpu.vector_store %arg10[%c8_92, %c24_93], %201 {strides = array<i32>} : memref<16x32xf32, #tpu.memory_space<vmem>>, vector<8x8xf32>,
    %c0_94 = arith.constant 0 : index
    %c0_95 = arith.constant 0 : index
    %203 = vector.load %arg10[%c0_94, %c0_95] : memref<16x32xf32, #tpu.memory_space<vmem>>, vector<16x32xf32>
    %cst_96 = arith.constant dense<0.000000e+00> : vector<16x32xf32>
    %204 = tpu.matmul %203, %122, %cst_96 {dimension_numbers = #tpu.dot_dimension_numbers<[1], [0], [0], [1], [0, 0, 1, 1], [], []>} : vector<16x32xf32>, vector<32x32xf32>, vector<16x32xf32> -> vector<16x32xf32>
    %205 = arith.addf %103, %204 : vector<16x32xf32>
    %c2 = arith.constant 2 : index
    %c0_97 = arith.constant 0 : index
    %206 = vector.load %arg4[%c2, %c0_97] : memref<3x32xf32, #tpu.memory_space<vmem>>, vector<1x32xf32>
    %207 = arith.mulf %205, %205 : vector<16x32xf32>
    %cst_98 = arith.constant dense<0.000000e+00> : vector<16xf32>
    %208 = vector.multi_reduction <add>, %207, %cst_98 [1] : vector<16x32xf32> to vector<16xf32>
    %209 = vector.shape_cast %208 : vector<16xf32> to vector<16x1xf32>
    %cst_99 = arith.constant 3.200000e+01 : f32
    %210 = vector.broadcast %cst_99 : f32 to vector<16x1xf32>
    %211 = arith.divf %209, %210 : vector<16x1xf32>
    %cst_100 = arith.constant 9.99999997E-7 : f32
    %212 = vector.broadcast %cst_100 : f32 to vector<16x1xf32>
    %213 = arith.addf %211, %212 : vector<16x1xf32>
    %214 = math.rsqrt %213 : vector<16x1xf32>
    %215 = vector.broadcast %214 : vector<16x1xf32> to vector<16x32xf32>
    %216 = arith.mulf %205, %215 : vector<16x32xf32>
    %217 = vector.broadcast %206 : vector<1x32xf32> to vector<16x32xf32>
    %218 = arith.mulf %216, %217 : vector<16x32xf32>
    %c0_101 = arith.constant 0 : index
    %c0_102 = arith.constant 0 : index
    %219 = vector.load %arg7[%c0_101, %c0_102] : memref<32x64xf32, #tpu.memory_space<vmem>>, vector<32x64xf32>
    %cst_103 = arith.constant dense<0.000000e+00> : vector<16x64xf32>
    %220 = tpu.matmul %218, %219, %cst_103 {dimension_numbers = #tpu.dot_dimension_numbers<[1], [0], [0], [1], [0, 0, 1, 1], [], []>} : vector<16x32xf32>, vector<32x64xf32>, vector<16x64xf32> -> vector<16x64xf32>
    %cst_104 = arith.constant 0.000000e+00 : f32
    %221 = vector.broadcast %cst_104 : f32 to vector<16x64xf32>
    %222 = arith.maximumf %220, %221 : vector<16x64xf32>
    %c0_105 = arith.constant 0 : index
    %c0_106 = arith.constant 0 : index
    %223 = vector.load %arg8[%c0_105, %c0_106] : memref<64x32xf32, #tpu.memory_space<vmem>>, vector<64x32xf32>
    %cst_107 = arith.constant dense<0.000000e+00> : vector<16x32xf32>
    %224 = tpu.matmul %222, %223, %cst_107 {dimension_numbers = #tpu.dot_dimension_numbers<[1], [0], [0], [1], [0, 0, 1, 1], [], []>} : vector<16x64xf32>, vector<64x32xf32>, vector<16x32xf32> -> vector<16x32xf32>
    %225 = arith.addf %205, %224 : vector<16x32xf32>
    %c0_108 = arith.constant 0 : index
    %c0_109 = arith.constant 0 : index
    %226 = vector.load %arg9[%c0_108, %c0_109] : memref<16x32xf32, #tpu.memory_space<vmem>>, vector<16x32xf32>
    tpu.vector_store %arg9[%c0_108, %c0_109], %225 {strides = array<i32>} : memref<16x32xf32, #tpu.memory_space<vmem>>, vector<16x32xf32>,
    return
  }
}

</mosaic_0001>

<bundles_post_ra>
// kernel: t5_decoder_block.1
= control target key start
LH: loop header
LB: loop body
LE: loop exit
PB: predicated region body
PF: predicated region fallthrough
CT: control target
= control target key end

     0   :  { %vm40_vm0 = vcmask 261120   ;;  %s4749_s0 = inlined_call_operand.vmem [shape: f32[16,32], index: 0, kind: input, shape index: {}]   ;;  %s4750_s1 = inlined_call_operand.vmem [shape: f32[16,32], index: 1, kind: input, shape index: {}]   ;;  %s4751_s2 = inlined_call_operand.vmem [shape: f32[64,8], index: 2, kind: input, shape index: {}]   ;;  %s4752_s3 = inlined_call_operand.vmem [shape: f32[64,8], index: 3, kind: input, shape index: {}]   ;;  %s4753_s4 = inlined_call_operand.vmem [shape: f32[3,32], index: 4, kind: input, shape index: {}]   ;;  %s4754_s5 = inlined_call_operand.vmem [shape: f32[32,128], index: 5, kind: input, shape index: {}]   ;;  %s4755_s6 = inlined_call_operand.vmem [shape: f32[32,128], index: 6, kind: input, shape index: {}]   ;;  %s4756_s7 = inlined_call_operand.vmem [shape: f32[32,64], index: 7, kind: input, shape index: {}]   ;;  %s4757_s8 = inlined_call_operand.vmem [shape: f32[64,32], index: 8, kind: input, shape index: {}]   ;;  %s4758_s9 = inlined_call_operand.hbm [shape: f32[16,32], index: 9, kind: output, shape index: {}]  }
   0x1   :  { %v4267_v0 = vld [vmem:[%s4749_s0] sm:$0xff]  ;;  %v4272_v1 = vld [vmem:[%s4749_s0 + $0x8] sm:$0xff] }
   0x2   :  { %14 = vsyncpa [#allocation4], 0  ;;  %v38_v2 = vmul.f32 %v4267_v0, %v4267_v0  ;;  %v39_v3 = vmul.f32 %v4272_v1, %v4272_v1  ;;  %v4283_v6 = vld [vmem:[%s4754_s5] sm:$0xff]  ;;  %v4288_v7 = vld [vmem:[%s4754_s5 + $0x8] sm:$0xff]  ;;  %s4203_s22 = smov 120   ;;  %v4204_v28 = vmov 0.0  }
   0x3   :  { %v4293_v8 = vld [vmem:[%s4754_s5 + $0x10] sm:$0xff]  ;;  %v4072_v9 = vpack.i.bf16 %v4288_v7, %v4283_v6  ;;  %v3996_v10 = vpack.c.bf16 %v4288_v7, %v4283_v6  ;;  %v4302_v11 = vld [vmem:[%s4754_s5 + $0x18] sm:$0xff]  ;;  %v3576_v20 = vld [vmem:[%s4753_s4] ss:$0 sm:$0xff]  ;;  %s4202_s5 = smov 96   ;;  %3762 = vmatprep.subr.mxu1 %v4204_v28  ;;  %s4205_s23 = smov 112  }
   0x4   :  { %v41_v4 = vsel %vm40_vm0, %v38_v2, 0.0  ;;  %v44_v5 = vsel %vm40_vm0, %v39_v3, 0.0  ;;  %v4000_v12 = vpack.c.bf16 %v4302_v11, %v4293_v8  ;;  %s4206_s24 = smov 104   ;;  %vm4207_vm1 = vmmov 0   ;;  %v147_v47 = vld [vmem:[%s4751_s2] sm:$0xff]  ;;  %v148_v51 = vld [vmem:[%s4751_s2 + $0x8] sm:$0xff] }
   0x5   :  { %42 = vadd.xlane.f32.xlu0 %v41_v4  ;;  %3997 = vmatprep.subr.bf16.mxu0 %v3996_v10  ;;  %vm191_vm2 = vcmask 64512   ;;  %v149_v56 = vld [vmem:[%s4751_s2 + $0x10] sm:$0xff]  ;;  %v150_v61 = vld [vmem:[%s4751_s2 + $0x18] sm:$0xff]  ;;  %v151_v62 = vld [vmem:[%s4751_s2 + $0x20] sm:$0xff]  ;;  %s4209_s19 = smov 8   ;;  %s4210_s20 = smov 16  }
   0x6   :  { %3999 = vmatpush3.bf16.msra.mxu0 %v3996_v10  ;;  %3764 = vmatprep.mubr.msk.f32.mxu1 %vm4207_vm1, %v4204_v28  ;;  %s4211_s21 = smov 24   ;;  %vm1069_vm3 = vcmask 130112   ;;  %vm1151_vm4 = vcmask 195712   ;;  %vm1233_vm5 = vcmask 261312   ;;  %vm3474_vm6 = vcmask 523264  }
   0x7   :  { %4001 = vmatprep.subr.bf16.mxu0 %v4000_v12 }
   0x9   :  { %45 = vadd.xlane.f32.xlu0 %v44_v5 }
   0xa   :  { %4003 = vmatpush3.bf16.msra.mxu0 %v4000_v12 }
   0xb   :  { %3777 = vmatprep.subr.mxu0 %v4204_v28 }
  0x92   :  { %v43_v13 = vpop.xlane.xlu0 %42 }
  0x93   :  { %v48_v14 = vmul.f32 0.03125, %v43_v13  ;;  %v153_v13 = vld [vmem:[%s4751_s2 + $0x30] sm:$0xff] }
  0x95   :  { %v50_v15 = vadd.f32 1e-06, %v48_v14  ;;  %v152_v14 = vld [vmem:[%s4751_s2 + $0x28] sm:$0xff] }
  0x96   :  { %v46_v16 = vpop.xlane.xlu0 %45 }
  0x97   :  { %4102 = vrsqrt.f32 %v50_v15  ;;  %v49_v17 = vmul.f32 0.03125, %v46_v16 }
  0x99   :  { %v51_v18 = vadd.f32 1e-06, %v49_v17 }
  0x9b   :  { %4104 = vrsqrt.f32 %v51_v18 }
  0xa1   :  { %v4103_v19 = vpop.eup %4102 }
  0xa2   :  { %v54_v21 = vmul.f32 %v4103_v19, %v4267_v0 }
  0xa4   :  { %v60_v22 = vmul.f32 %v3576_v20, %v54_v21 }
  0xa5   :  { %v4105_v23 = vpop.eup %4104 }
  0xa6   :  { %v55_v24 = vmul.f32 %v4105_v23, %v4272_v1  ;;  %3759 = vmatprep.mubr.msk.f32.mxu0 %vm40_vm0, %v60_v22  ;;  %v154_v23 = vld [vmem:[%s4751_s2 + $0x38] sm:$0xff]  ;;  %s4208_s2 = smov 32  }
  0xa8   :  { %v61_v25 = vmul.f32 %v3576_v20, %v55_v24 }
  0xaa   :  { %3760 = vmatmul.mubr.msk.f32.vlgmr.msra.gmra.mrb[0].mxu0 %vm40_vm0, %v61_v25 }
  0xab   :  { %3779 = vmatprep.mubr.msk.f32.mxu0 %vm4207_vm1, %v4204_v28 }
 0x17d   :  { %v3761_v26 = vpop.f32.mrb[0].mxu0 }
 0x17e   :  { %487 = vrot.lane.b32.xlu1 %v3761_v26, %s4202_s5  ;;  %v138_v27 = vpop.f32.mrb[1].mxu0 }
 0x17f   :  { %264 = vrot.lane.b32.xlu0 %v138_v27, %s4203_s22 }
 0x182   :  { %156 = vrot.lane.b32.xlu1 %v138_v27, %s4202_s5 }
 0x186   :  { %594 = vrot.lane.b32.xlu1 %v3761_v26, %s4203_s22 }
 0x18a   :  { %668 = vrot.lane.b32.xlu1 %v3761_v26, %s4205_s23 }
 0x18e   :  { %742 = vrot.lane.b32.xlu1 %v3761_v26, %s4206_s24 }
 0x192   :  { %338 = vrot.lane.b32.xlu1 %v138_v27, %s4205_s23 }
 0x196   :  { %412 = vrot.lane.b32.xlu1 %v138_v27, %s4206_s24 }
 0x1f0   :  { %v488_v29 = vpop.permute.xlu1 %487 }
 0x1f1   :  { %490 = vxpose.xlu0.b32.start.end [1/1] (short) (narrow) %v488_v29, 64  ;;  %v265_v35 = vpop.permute.xlu0 %264 }
 0x1f4   :  { %v157_v30 = vpop.permute.xlu1 %156 }
 0x1f5   :  { %159 = vxpose.xlu1.b32.start.end [1/1] (short) (narrow) %v157_v30, 64 }
 0x1f8   :  { %v595_v31 = vpop.permute.xlu1 %594 }
 0x1fc   :  { %v669_v32 = vpop.permute.xlu1 %668 }
 0x200   :  { %v743_v33 = vpop.permute.xlu1 %742 }
 0x204   :  { %v339_v34 = vpop.permute.xlu1 %338 }
 0x208   :  { %v413_v36 = vpop.permute.xlu1 %412 }
 0x271   :  { %v506_v37 = vpop.trf.xlu0 }
 0x275   :  { %v175_v38 = vpop.trf.xlu1  ;;  %v507_v40 = vpop.trf.xlu0 }
 0x276   :  { %3763 = vmatpush3.msra.mxu1 %v175_v38 }
 0x277   :  { %3765 = vmatmul.mubr.msk.f32.vlgmr.msra.gmra.mrb[0].mxu1 %vm191_vm2, %v138_v27  ;;  %3767 = vmatprep.subr.mxu1 %v4204_v28 }
 0x278   :  { %3769 = vmatprep.mubr.msk.f32.mxu1 %vm4207_vm1, %v4204_v28 }
 0x279   :  { %v176_v39 = vpop.trf.xlu1  ;;  %v508_v42 = vpop.trf.xlu0 }
 0x27a   :  { %3768 = vmatpush3.msra.mxu1 %v176_v39 }
 0x27b   :  { %3770 = vmatmul.mubr.msk.f32.vlgmr.msra.gmra.mrb[2].mxu1 %vm191_vm2, %v265_v35  ;;  %3772 = vmatprep.subr.mxu1 %v4204_v28 }
 0x27c   :  { %3774 = vmatprep.mubr.msk.f32.mxu1 %vm4207_vm1, %v4204_v28 }
 0x27d   :  { %v177_v41 = vpop.trf.xlu1  ;;  %v509_v44 = vpop.trf.xlu0 }
 0x27e   :  { %3773 = vmatpush3.msra.mxu1 %v177_v41 }
 0x27f   :  { %3775 = vmatmul.mubr.msk.f32.vlgmr.msra.gmra.mrb[4].mxu1 %vm191_vm2, %v339_v34  ;;  %3782 = vmatprep.subr.mxu1 %v4204_v28 }
 0x280   :  { %3783 = vmatpush3.msra.mxu1 %v506_v37  ;;  %3784 = vmatprep.mubr.msk.f32.mxu1 %vm4207_vm1, %v4204_v28 }
 0x281   :  { %v178_v43 = vpop.trf.xlu1  ;;  %3792 = vmatprep.subr.mxu1 %v4204_v28 }
 0x282   :  { %3778 = vmatpush3.msra.mxu0 %v178_v43 }
 0x283   :  { %3780 = vmatmul.mubr.msk.f32.vlgmr.msra.gmra.mrb[2].mxu0 %vm191_vm2, %v413_v36  ;;  %3785 = vmatmul.mubr.msk.f32.vlgmr.msra.gmra.mrb[6].mxu1 %vm191_vm2, %v3761_v26 }
 0x284   :  { %3787 = vmatprep.subr.mxu0 %v4204_v28  ;;  %3789 = vmatprep.mubr.msk.f32.mxu0 %vm4207_vm1, %v4204_v28 }
 0x285   :  { %3788 = vmatpush3.msra.mxu0 %v507_v40  ;;  %3793 = vmatpush3.msra.mxu1 %v508_v42  ;;  %v179_v45 = vpop.trf.xlu1 }
 0x286   :  { %3794 = vmatprep.mubr.msk.f32.mxu1 %vm4207_vm1, %v4204_v28  ;;  %3797 = vmatprep.subr.mxu0 %v4204_v28 }
 0x287   :  { %3790 = vmatmul.mubr.msk.f32.vlgmr.msra.gmra.mrb[4].mxu0 %vm191_vm2, %v595_v31  ;;  %3795 = vmatmul.mubr.msk.f32.vlgmr.msra.gmra.mrb[8].mxu1 %vm191_vm2, %v669_v32  ;;  %v4395_v31 = vpop.trf.xlu0 }
 0x288   :  { %3798 = vmatpush3.msra.mxu0 %v509_v44  ;;  %3799 = vmatprep.mubr.msk.f32.mxu0 %vm4207_vm1, %v4204_v28 }
 0x289   :  { %3802 = vmatprep.subr.mxu1 %v4204_v28  ;;  %3807 = vmatprep.subr.mxu0 %v4204_v28  ;;  %v180_v46 = vpop.trf.xlu1 }
 0x28a   :  { %3804 = vmatprep.mubr.msk.f32.mxu1 %vm4207_vm1, %v4204_v28 }
 0x28b   :  { %3800 = vmatmul.mubr.msk.f32.vlgmr.msra.gmra.mrb[6].mxu0 %vm191_vm2, %v743_v33  ;;  %v4397_v32 = vpop.trf.xlu0 }
 0x28c   :  { %3809 = vmatprep.mubr.msk.f32.mxu0 %vm4207_vm1, %v4204_v28  ;;  %3803 = vmatpush3.xpose.msk.msra.mxu1 %vm191_vm2, %v179_v45 }
 0x28d   :  { %3812 = vmatprep.subr.mxu1 %v4204_v28  ;;  %v4401_v34 = vpop.trf.xlu1 }
 0x28f   :  { %3808 = vmatpush3.xpose.msk.msra.mxu0 %vm191_vm2, %v180_v46  ;;  %v4399_v33 = vpop.trf.xlu0 }
 0x290   :  { %3817 = vmatprep.subr.mxu0 %v4204_v28 }
 0x291   :  { %v4405_v36 = vpop.trf.xlu1 }
 0x293   :  { %v4403_v35 = vpop.trf.xlu0 }
 0x34a   :  { %v260_v48 = vpop.f32.mrb[0].mxu1 }
 0x34b   :  { %v816_v49 = vadd.f32 %v260_v48, %v147_v47  ;;  %v3766_v50 = vpop.f32.mrb[1].mxu1 }
 0x34d   :  { %v824_v52 = vsel %vm191_vm2, %v816_v49, -inf }
 0x34e   :  { %825 = vmax.xlane.f32.xlu0 %v824_v52  ;;  %v334_v53 = vpop.f32.mrb[2].mxu1 }
 0x34f   :  { %v817_v54 = vadd.f32 %v334_v53, %v148_v51  ;;  %v3771_v55 = vpop.f32.mrb[3].mxu1 }
 0x351   :  { %v827_v57 = vsel %vm191_vm2, %v817_v54, -inf }
 0x352   :  { %828 = vmax.xlane.f32.xlu1 %v827_v57  ;;  %v408_v58 = vpop.f32.mrb[4].mxu1 }
 0x353   :  { %v818_v59 = vadd.f32 %v408_v58, %v149_v56  ;;  %v3776_v60 = vpop.f32.mrb[5].mxu1 }
 0x355   :  { %v830_v63 = vsel %vm191_vm2, %v818_v59, -inf }
 0x356   :  { %831 = vmax.xlane.f32.xlu0 %v830_v63  ;;  %v482_v2 = vpop.f32.mrb[2].mxu0  ;;  %v590_v3 = vpop.f32.mrb[6].mxu1 }
 0x357   :  { %v819_v4 = vadd.f32 %v482_v2, %v150_v61  ;;  %v820_v5 = vadd.f32 %v590_v3, %v151_v62  ;;  %v3781_v10 = vpop.f32.mrb[3].mxu0  ;;  %v3786_v12 = vpop.f32.mrb[7].mxu1 }
 0x359   :  { %v836_v15 = vsel %vm191_vm2, %v820_v5, -inf  ;;  %v833_v16 = vsel %vm191_vm2, %v819_v4, -inf }
 0x35a   :  { %837 = vmax.xlane.f32.xlu0 %v836_v15  ;;  %v738_v17 = vpop.f32.mrb[8].mxu1  ;;  %834 = vmax.xlane.f32.xlu1 %v833_v16  ;;  %v664_v18 = vpop.f32.mrb[4].mxu0 }
 0x35b   :  { %v822_v19 = vadd.f32 %v738_v17, %v153_v13  ;;  %v821_v20 = vadd.f32 %v664_v18, %v152_v14  ;;  %v3791_v21 = vpop.f32.mrb[5].mxu0  ;;  %v3796_v22 = vpop.f32.mrb[9].mxu1 }
 0x35d   :  { %v842_v24 = vsel %vm191_vm2, %v822_v19, -inf  ;;  %v839_v25 = vsel %vm191_vm2, %v821_v20, -inf }
 0x35e   :  { %843 = vmax.xlane.f32.xlu0 %v842_v24  ;;  %840 = vmax.xlane.f32.xlu1 %v839_v25  ;;  %v812_v26 = vpop.f32.mrb[6].mxu0 }
 0x35f   :  { %v823_v27 = vadd.f32 %v812_v26, %v154_v23  ;;  %v3801_v29 = vpop.f32.mrb[7].mxu0 }
 0x361   :  { %v845_v30 = vsel %vm191_vm2, %v823_v27, -inf }
 0x362   :  { %846 = vmax.xlane.f32.xlu1 %v845_v30 }
 0x3db   :  { %v826_v37 = vpop.xlane.xlu0 %825 }
 0x3dc   :  { %v848_v38 = vsub.f32 %v816_v49, %v826_v37 }
 0x3de   :  { %v856_v39 = vmul.f32 1.442695, %v848_v38 }
 0x3df   :  { %v829_v40 = vpop.xlane.xlu1 %828 }
 0x3e0   :  { %4106 = vpow2.f32 %v856_v39  ;;  %v849_v41 = vsub.f32 %v817_v54, %v829_v40 }
 0x3e2   :  { %v858_v42 = vmul.f32 1.442695, %v849_v41 }
 0x3e3   :  { %v832_v43 = vpop.xlane.xlu0 %831 }
 0x3e4   :  { %4108 = vpow2.f32 %v858_v42  ;;  %v850_v44 = vsub.f32 %v818_v59, %v832_v43 }
 0x3e6   :  { %v860_v45 = vmul.f32 1.442695, %v850_v44 }
 0x3e7   :  { %v838_v46 = vpop.xlane.xlu0 %837  ;;  %v835_v47 = vpop.xlane.xlu1 %834 }
 0x3e8   :  { %4110 = vpow2.f32 %v860_v45  ;;  %v852_v48 = vsub.f32 %v820_v5, %v838_v46  ;;  %v851_v50 = vsub.f32 %v819_v4, %v835_v47 }
 0x3ea   :  { %v4107_v51 = vpop.eup %4106  ;;  %v864_v52 = vmul.f32 1.442695, %v852_v48  ;;  %v862_v53 = vmul.f32 1.442695, %v851_v50 }
 0x3eb   :  { %v844_v55 = vpop.xlane.xlu0 %843  ;;  %v841_v56 = vpop.xlane.xlu1 %840  ;;  %v872_v49 = vsel %vm191_vm2, %v4107_v51, 0.0 }
 0x3ec   :  { %4112 = vpow2.f32 %v864_v52  ;;  %v854_v57 = vsub.f32 %v822_v19, %v844_v55  ;;  %v853_v54 = vsub.f32 %v821_v20, %v841_v56  ;;  %873 = vadd.xlane.f32.xlu0 %v872_v49 }
 0x3ed   :  { %4114 = vpow2.f32 %v862_v53 }
 0x3ee   :  { %v4109_v58 = vpop.eup %4108  ;;  %v868_v59 = vmul.f32 1.442695, %v854_v57  ;;  %v866_v60 = vmul.f32 1.442695, %v853_v54 }
 0x3ef   :  { %v847_v61 = vpop.xlane.xlu1 %846  ;;  %v875_v62 = vsel %vm191_vm2, %v4109_v58, 0.0 }
 0x3f0   :  { %4116 = vpow2.f32 %v868_v59  ;;  %v855_v63 = vsub.f32 %v823_v27, %v847_v61  ;;  %876 = vadd.xlane.f32.xlu1 %v875_v62  ;;  %v4077_v59 = vpack.i.bf16 %v4302_v11, %v4293_v8 }
 0x3f1   :  { %4118 = vpow2.f32 %v866_v60 }
 0x3f2   :  { %v4111_v2 = vpop.eup %4110  ;;  %v870_v3 = vmul.f32 1.442695, %v855_v63 }
 0x3f3   :  { %v878_v4 = vsel %vm191_vm2, %v4111_v2, 0.0 }
 0x3f4   :  { %4120 = vpow2.f32 %v870_v3  ;;  %879 = vadd.xlane.f32.xlu0 %v878_v4 }
 0x3f6   :  { %v4113_v5 = vpop.eup %4112 }
 0x3f7   :  { %v4115_v10 = vpop.eup %4114  ;;  %v884_v12 = vsel %vm191_vm2, %v4113_v5, 0.0 }
 0x3f8   :  { %885 = vadd.xlane.f32.xlu0 %v884_v12  ;;  %v881_v13 = vsel %vm191_vm2, %v4115_v10, 0.0 }
 0x3f9   :  { %882 = vadd.xlane.f32.xlu1 %v881_v13 }
 0x3fa   :  { %v4117_v14 = vpop.eup %4116 }
 0x3fb   :  { %v4119_v15 = vpop.eup %4118  ;;  %v890_v16 = vsel %vm191_vm2, %v4117_v14, 0.0 }
 0x3fc   :  { %891 = vadd.xlane.f32.xlu0 %v890_v16  ;;  %v887_v17 = vsel %vm191_vm2, %v4119_v15, 0.0 }
 0x3fd   :  { %888 = vadd.xlane.f32.xlu1 %v887_v17 }
 0x3fe   :  { %v4121_v18 = vpop.eup %4120 }
 0x3ff   :  { %v893_v19 = vsel %vm191_vm2, %v4121_v18, 0.0 }
 0x401   :  { %894 = vadd.xlane.f32.xlu1 %v893_v19 }
 0x412   :  { %4073 = vrot.lane.b32.xlu0 %v4072_v9, %s4208_s2 }
 0x479   :  { %v874_v20 = vpop.xlane.xlu0 %873 }
 0x47a   :  { %4122 = vrcp.f32 %v874_v20 }
 0x47d   :  { %v877_v21 = vpop.xlane.xlu1 %876 }
 0x47e   :  { %4124 = vrcp.f32 %v877_v21 }
 0x481   :  { %v880_v22 = vpop.xlane.xlu0 %879 }
 0x482   :  { %4126 = vrcp.f32 %v880_v22 }
 0x484   :  { %v4123_v23 = vpop.eup %4122 }
 0x485   :  { %v904_v24 = vmul.f32 %v4123_v23, %v4107_v51  ;;  %v886_v25 = vpop.xlane.xlu0 %885 }
 0x486   :  { %4128 = vrcp.f32 %v886_v25  ;;  %v883_v26 = vpop.xlane.xlu1 %882  ;;  %v1679_v25 = vld [vmem:[%s4755_s6] sm:$0xff] }
 0x487   :  { %4130 = vrcp.f32 %v883_v26  ;;  %3805 = vmatmul.mubr.msk.f32.vlgmr.msra.gmra.mrb[10].mxu1 %vm191_vm2, %v904_v24  ;;  %v1680_v26 = vld [vmem:[%s4755_s6 + $0x8] sm:$0xff] }
 0x488   :  { %v4125_v27 = vpop.eup %4124  ;;  %3813 = vmatpush3.xpose.msk.msra.mxu1 %vm191_vm2, %v4401_v34  ;;  %3814 = vmatprep.mubr.msk.f32.mxu1 %vm4207_vm1, %v4204_v28 }
 0x489   :  { %v905_v29 = vmul.f32 %v4125_v27, %v4109_v58  ;;  %v892_v30 = vpop.xlane.xlu0 %891  ;;  %3822 = vmatprep.subr.mxu1 %v4204_v28  ;;  %v4500_v27 = vpack.i.bf16 %v1680_v26, %v1679_v25 }
 0x48a   :  { %4132 = vrcp.f32 %v892_v30  ;;  %v889_v37 = vpop.xlane.xlu1 %888 }
 0x48b   :  { %4134 = vrcp.f32 %v889_v37  ;;  %3810 = vmatmul.mubr.msk.f32.vlgmr.msra.gmra.mrb[8].mxu0 %vm191_vm2, %v905_v29  ;;  %v4012_v29 = vpack.c.bf16 %v1680_v26, %v1679_v25  ;;  %v35_v37 = vld [vmem:[%s4750_s1] sm:$0xff] }
 0x48c   :  { %v4127_v38 = vpop.eup %4126  ;;  %3818 = vmatpush3.xpose.msk.msra.mxu0 %vm191_vm2, %v4405_v36  ;;  %3819 = vmatprep.mubr.msk.f32.mxu0 %vm4207_vm1, %v4204_v28 }
 0x48d   :  { %v906_v34 = vmul.f32 %v4127_v38, %v4111_v2  ;;  %3827 = vmatprep.subr.mxu0 %v4204_v28 }
 0x48e   :  { %v895_v39 = vpop.xlane.xlu1 %894 }
 0x48f   :  { %4136 = vrcp.f32 %v895_v39  ;;  %3815 = vmatmul.mubr.msk.f32.vlgmr.msra.gmra.mrb[12].mxu1 %vm191_vm2, %v906_v34 }
 0x490   :  { %v4129_v40 = vpop.eup %4128  ;;  %3823 = vmatpush3.xpose.msk.msra.mxu1 %vm191_vm2, %v4395_v31  ;;  %3824 = vmatprep.mubr.msk.f32.mxu1 %vm4207_vm1, %v4204_v28 }
 0x491   :  { %v4131_v41 = vpop.eup %4130  ;;  %v908_v42 = vmul.f32 %v4129_v40, %v4113_v5  ;;  %3832 = vmatprep.subr.mxu1 %v4204_v28 }
 0x492   :  { %v907_v36 = vmul.f32 %v4131_v41, %v4115_v10 }
 0x493   :  { %3825 = vmatmul.mubr.msk.f32.vlgmr.msra.gmra.mrb[14].mxu1 %vm191_vm2, %v908_v42 }
 0x494   :  { %v4133_v43 = vpop.eup %4132  ;;  %3820 = vmatmul.mubr.msk.f32.vlgmr.msra.gmra.mrb[10].mxu0 %vm191_vm2, %v907_v36  ;;  %3833 = vmatpush3.xpose.msk.msra.mxu1 %vm191_vm2, %v4399_v33  ;;  %v4074_v33 = vpop.permute.xlu0 %4073 }
 0x495   :  { %v4135_v44 = vpop.eup %4134  ;;  %v910_v45 = vmul.f32 %v4133_v43, %v4117_v14  ;;  %3828 = vmatpush3.xpose.msk.msra.mxu0 %vm191_vm2, %v4397_v32  ;;  %3829 = vmatprep.mubr.msk.f32.mxu0 %vm4207_vm1, %v4204_v28  ;;  %v4076_v47 = vunpack.i.h.bf16 %v4074_v33  ;;  %v4075_v48 = vunpack.i.l.bf16 %v4074_v33 }
 0x496   :  { %v909_v31 = vmul.f32 %v4135_v44, %v4119_v15  ;;  %3834 = vmatprep.mubr.msk.f32.mxu1 %vm4207_vm1, %v4204_v28  ;;  %3837 = vmatprep.subr.mxu0 %v4204_v28 }
 0x497   :  { %3835 = vmatmul.mubr.msk.f32.vlgmr.msra.gmra.mrb[16].mxu1 %vm191_vm2, %v910_v45  ;;  %v4004_v50 = vpack.c.bf16 %v4076_v47, %v4075_v48  ;;  %v36_v47 = vld [vmem:[%s4750_s1 + $0x8] sm:$0xff] }
 0x498   :  { %3830 = vmatmul.mubr.msk.f32.vlgmr.msra.gmra.mrb[12].mxu0 %vm191_vm2, %v909_v31  ;;  %3872 = vmatprep.mubr.msk.f32.mxu1 %vm40_vm0, %v35_v37 }
 0x499   :  { %v4137_v46 = vpop.eup %4136  ;;  %3838 = vmatpush3.xpose.msk.msra.mxu0 %vm191_vm2, %v4403_v35  ;;  %3839 = vmatprep.mubr.msk.f32.mxu0 %vm4207_vm1, %v4204_v28 }
 0x49a   :  { %v911_v32 = vmul.f32 %v4137_v46, %v4121_v18  ;;  %4005 = vmatprep.subr.bf16.mxu0 %v4004_v50 }
 0x49c   :  { %3840 = vmatmul.mubr.msk.f32.vlgmr.msra.gmra.mrb[14].mxu0 %vm191_vm2, %v911_v32 }
 0x49d   :  { %4007 = vmatpush3.bf16.msra.mxu0 %v4004_v50 }
 0x55a   :  { %v984_v51 = vpop.f32.mrb[10].mxu1 }
 0x55b   :  { %988 = vst.msk [vmem:[#allocation2] sm:$0xff] %vm191_vm2, %v984_v51  ;;  %v3806_v35 = vpop.f32.mrb[11].mxu1  ;;  %v3605_v51 = vld [vmem:[%s4753_s4 + $0x1] ss:$0 sm:$0xff] }
 0x55e   :  { %v1061_v52 = vpop.f32.mrb[8].mxu0 }
 0x55f   :  { %1066 = vrot.lane.b32.xlu0 %v1061_v52, %s4209_s19  ;;  %v3811_v53 = vpop.f32.mrb[9].mxu0 }
 0x562   :  { %v1143_v55 = vpop.f32.mrb[12].mxu1 }
 0x563   :  { %v3816_v56 = vpop.f32.mrb[13].mxu1  ;;  %1148 = vrot.lane.b32.xlu1 %v1143_v55, %s4210_s20 }
 0x566   :  { %v1307_v6 = vpop.f32.mrb[14].mxu1 }
 0x567   :  { %v1225_v7 = vpop.f32.mrb[10].mxu0  ;;  %1311 = vst.msk [vmem:[#allocation2 + $0x8] sm:$0xff] %vm191_vm2, %v1307_v6  ;;  %v3826_v9 = vpop.f32.mrb[15].mxu1 }
 0x568   :  { %1230 = vrot.lane.b32.xlu1 %v1225_v7, %s4211_s21  ;;  %v3821_v49 = vpop.f32.mrb[11].mxu0 }
 0x56a   :  { %v1465_v57 = vpop.f32.mrb[16].mxu1 }
 0x56b   :  { %v1384_v54 = vpop.f32.mrb[12].mxu0  ;;  %v3836_v58 = vpop.f32.mrb[17].mxu1  ;;  %1470 = vrot.lane.b32.xlu0 %v1465_v57, %s4210_s20 }
 0x56c   :  { %1389 = vrot.lane.b32.xlu1 %v1384_v54, %s4209_s19  ;;  %v3831_v60 = vpop.f32.mrb[13].mxu0 }
 0x56f   :  { %v1546_v61 = vpop.f32.mrb[14].mxu0  ;;  %4078 = vrot.lane.b32.xlu0 %v4077_v59, %s4208_s2 }
 0x570   :  { %1551 = vrot.lane.b32.xlu1 %v1546_v61, %s4211_s21  ;;  %v3841_v62 = vpop.f32.mrb[15].mxu0 }
 0x5d1   :  { %v1067_v63 = vpop.permute.xlu0 %1066 }
 0x5d2   :  { %1070 = vst.msk [vmem:[#allocation2] sm:$0xff] %vm1069_vm3, %v1067_v63 }
 0x5d5   :  { %v1149_v2 = vpop.permute.xlu1 %1148 }
 0x5d6   :  { %1152 = vst.msk [vmem:[#allocation2] sm:$0xff] %vm1151_vm4, %v1149_v2 }
 0x5da   :  { %v1231_v3 = vpop.permute.xlu1 %1230 }
 0x5db   :  { %1234 = vst.msk [vmem:[#allocation2] sm:$0xff] %vm1233_vm5, %v1231_v3 }
 0x5dd   :  { %v1471_v8 = vpop.permute.xlu0 %1470 }
 0x5de   :  { %v1390_v11 = vpop.permute.xlu1 %1389 }
 0x5df   :  { %1392 = vst.msk [vmem:[#allocation2 + $0x8] sm:$0xff] %vm1069_vm3, %v1390_v11 }
 0x5e0   :  { %1473 = vst.msk [vmem:[#allocation2 + $0x8] sm:$0xff] %vm1151_vm4, %v1471_v8 }
 0x5e1   :  { %v4079_v4 = vpop.permute.xlu0 %4078 }
 0x5e2   :  { %v4081_v5 = vunpack.i.h.bf16 %v4079_v4  ;;  %v4080_v10 = vunpack.i.l.bf16 %v4079_v4  ;;  %v1552_v12 = vpop.permute.xlu1 %1551  ;;  %v1555_v13 = vld [vmem:[#allocation2] sm:$0xff] }
 0x5e3   :  { %1554 = vst.msk [vmem:[#allocation2 + $0x8] sm:$0xff] %vm1233_vm5, %v1552_v12  ;;  %3850 = vmatprep.mubr.msk.f32.mxu0 %vm40_vm0, %v1555_v13  ;;  %v1861_v12 = vld [vmem:[%s4752_s3] sm:$0xff] }
 0x5e4   :  { %v4008_v14 = vpack.c.bf16 %v4081_v5, %v4080_v10 }
 0x5e6   :  { %4009 = vmatprep.subr.bf16.mxu0 %v4008_v14 }
 0x5e7   :  { %4011 = vmatpush3.bf16.msra.mxu0 %v4008_v14 }
 0x5e8   :  { %4013 = vmatprep.subr.bf16.mxu0 %v4012_v29 }
 0x5ea   :  { %v1556_v15 = vld [vmem:[#allocation2 + $0x8] sm:$0xff] }
 0x5eb   :  { %3851 = vmatmul.mubr.msk.f32.vlgmr.msra.gmra.mrb[16].mxu0 %vm40_vm0, %v1556_v15 }
 0x5ec   :  { %4015 = vmatpush3.bf16.msra.mxu0 %v4012_v29  ;;  %v1864_v29 = vld [vmem:[%s4752_s3 + $0x18] sm:$0xff] }
 0x6be   :  { %v3852_v16 = vpop.f32.mrb[16].mxu0 }
 0x6bf   :  { %v4475_v17 = vadd.f32 %v3852_v16, %v4272_v1  ;;  %v1645_v18 = vpop.f32.mrb[17].mxu0  ;;  %v1681_v1 = vld [vmem:[%s4755_s6 + $0x10] sm:$0xff]  ;;  %v1862_v16 = vld [vmem:[%s4752_s3 + $0x8] sm:$0xff] }
 0x6c0   :  { %v4478_v19 = vadd.f32 %v1645_v18, %v4267_v0  ;;  %v1682_v0 = vld [vmem:[%s4755_s6 + $0x18] sm:$0xff] }
 0x6c1   :  { %v1658_v20 = vmul.f32 %v4475_v17, %v4475_v17  ;;  %v4492_v24 = vpack.i.bf16 %v1682_v0, %v1681_v1  ;;  %v4016_v30 = vpack.c.bf16 %v1682_v0, %v1681_v1 }
 0x6c2   :  { %v1657_v21 = vmul.f32 %v4478_v19, %v4478_v19 }
 0x6c3   :  { %v1662_v22 = vsel %vm40_vm0, %v1658_v20, 0.0  ;;  %4017 = vmatprep.subr.bf16.mxu0 %v4016_v30 }
 0x6c4   :  { %1663 = vadd.xlane.f32.xlu0 %v1662_v22  ;;  %v1659_v23 = vsel %vm40_vm0, %v1657_v21, 0.0  ;;  %4019 = vmatpush3.bf16.msra.mxu0 %v4016_v30  ;;  %v1865_v30 = vld [vmem:[%s4752_s3 + $0x20] sm:$0xff] }
 0x6c5   :  { %1660 = vadd.xlane.f32.xlu1 %v1659_v23  ;;  %3875 = vmatprep.subr.mxu0 %v4204_v28  ;;  %v1863_v23 = vld [vmem:[%s4752_s3 + $0x10] sm:$0xff] }
 0x6d6   :  { %4088 = vrot.lane.b32.xlu1 %v4492_v24, %s4202_s5 }
 0x6da   :  { %4083 = vrot.lane.b32.xlu0 %v4500_v27, %s4202_s5 }
 0x751   :  { %v1664_v38 = vpop.xlane.xlu0 %1663 }
 0x752   :  { %v1666_v34 = vmul.f32 0.03125, %v1664_v38  ;;  %v1661_v39 = vpop.xlane.xlu1 %1660 }
 0x753   :  { %v1665_v40 = vmul.f32 0.03125, %v1661_v39 }
 0x754   :  { %v1668_v41 = vadd.f32 1e-06, %v1666_v34 }
 0x755   :  { %v1667_v42 = vadd.f32 1e-06, %v1665_v40  ;;  %v4084_v36 = vpop.permute.xlu0 %4083 }
 0x756   :  { %4138 = vrsqrt.f32 %v1668_v41  ;;  %v4086_v43 = vunpack.i.h.bf16 %v4084_v36  ;;  %v4085_v44 = vunpack.i.l.bf16 %v4084_v36  ;;  %v4089_v45 = vpop.permute.xlu1 %4088  ;;  %v1867_v36 = vld [vmem:[%s4752_s3 + $0x30] sm:$0xff] }
 0x757   :  { %4140 = vrsqrt.f32 %v1667_v42  ;;  %v4091_v31 = vunpack.i.h.bf16 %v4089_v45  ;;  %v4090_v46 = vunpack.i.l.bf16 %v4089_v45 }
 0x758   :  { %v4020_v32 = vpack.c.bf16 %v4086_v43, %v4085_v44  ;;  %v1866_v43 = vld [vmem:[%s4752_s3 + $0x28] sm:$0xff] }
 0x759   :  { %v4024_v33 = vpack.c.bf16 %v4091_v31, %v4090_v46 }
 0x75a   :  { %4021 = vmatprep.subr.bf16.mxu1 %v4020_v32 }
 0x75b   :  { %4023 = vmatpush3.bf16.msra.mxu1 %v4020_v32 }
 0x75c   :  { %4025 = vmatprep.subr.bf16.mxu1 %v4024_v33 }
 0x75f   :  { %4027 = vmatpush3.bf16.msra.mxu1 %v4024_v33 }
 0x760   :  { %v4139_v48 = vpop.eup %4138  ;;  %3885 = vmatprep.subr.mxu1 %v4204_v28 }
 0x761   :  { %v4141_v50 = vpop.eup %4140  ;;  %v1672_v35 = vmul.f32 %v4139_v48, %v4475_v17 }
 0x762   :  { %v1671_v52 = vmul.f32 %v4141_v50, %v4478_v19  ;;  %3873 = vmatmul.mubr.msk.f32.vlgmr.msra.gmra.mrb[18].mxu1 %vm40_vm0, %v36_v47  ;;  %v1868_v50 = vld [vmem:[%s4752_s3 + $0x38] sm:$0xff] }
 0x763   :  { %3887 = vmatprep.mubr.msk.f32.mxu1 %vm4207_vm1, %v4204_v28  ;;  %v1678_v55 = vmul.f32 %v3605_v51, %v1672_v35 }
 0x764   :  { %v1677_v53 = vmul.f32 %v3605_v51, %v1671_v52 }
 0x766   :  { %3861 = vmatprep.mubr.msk.f32.mxu0 %vm40_vm0, %v1677_v53 }
 0x767   :  { %3862 = vmatmul.mubr.msk.f32.vlgmr.msra.gmra.mrb[18].mxu0 %vm40_vm0, %v1678_v55 }
 0x768   :  { %3877 = vmatprep.mubr.msk.f32.mxu0 %vm4207_vm1, %v4204_v28 }
 0x835   :  { %v3874_v56 = vpop.f32.mrb[18].mxu1 }
 0x836   :  { %v1852_v6 = vpop.f32.mrb[19].mxu1 }
 0x83a   :  { %v3863_v7 = vpop.f32.mrb[18].mxu0 }
 0x83b   :  { %2375 = vrot.lane.b32.xlu1 %v3863_v7, %s4205_s23  ;;  %2301 = vrot.lane.b32.xlu0 %v3863_v7, %s4203_s22  ;;  %v1755_v9 = vpop.f32.mrb[19].mxu0 }
 0x83f   :  { %2449 = vrot.lane.b32.xlu0 %v3863_v7, %s4206_s24  ;;  %1974 = vrot.lane.b32.xlu1 %v1755_v9, %s4203_s22 }
 0x843   :  { %2048 = vrot.lane.b32.xlu0 %v1755_v9, %s4205_s23  ;;  %2122 = vrot.lane.b32.xlu1 %v1755_v9, %s4206_s24 }
 0x861   :  { %2196 = vxpose.xlu0.b32.start.end [1/1] (short) (narrow) %v3874_v56, 64 }
 0x86c   :  { %1869 = vxpose.xlu1.b32.start.end [1/1] (short) (narrow) %v1852_v6, 64 }
 0x8ad   :  { %v2302_v49 = vpop.permute.xlu0 %2301  ;;  %v2376_v57 = vpop.permute.xlu1 %2375 }
 0x8b1   :  { %v2450_v54 = vpop.permute.xlu0 %2449  ;;  %v1975_v58 = vpop.permute.xlu1 %1974 }
 0x8b5   :  { %v2049_v59 = vpop.permute.xlu0 %2048  ;;  %v2123_v60 = vpop.permute.xlu1 %2122 }
 0x8e1   :  { %v2212_v61 = vpop.trf.xlu0 }
 0x8e5   :  { %v2213_v2 = vpop.trf.xlu0 }
 0x8e9   :  { %v2214_v8 = vpop.trf.xlu0 }
 0x8ec   :  { %v1885_v62 = vpop.trf.xlu1 }
 0x8ed   :  { %3876 = vmatpush3.msra.mxu0 %v1885_v62  ;;  %v2215_v4 = vpop.trf.xlu0 }
 0x8ee   :  { %3878 = vmatmul.mubr.msk.f32.vlgmr.msra.gmra.mrb[20].mxu0 %vm191_vm2, %v1755_v9  ;;  %3880 = vmatprep.subr.mxu0 %v4204_v28 }
 0x8ef   :  { %3882 = vmatprep.mubr.msk.f32.mxu0 %vm4207_vm1, %v4204_v28 }
 0x8f0   :  { %v1886_v63 = vpop.trf.xlu1 }
 0x8f1   :  { %3881 = vmatpush3.msra.mxu0 %v1886_v63  ;;  %v4601_v6 = vpop.trf.xlu0 }
 0x8f2   :  { %3883 = vmatmul.mubr.msk.f32.vlgmr.msra.gmra.mrb[22].mxu0 %vm191_vm2, %v1975_v58  ;;  %3890 = vmatprep.subr.mxu0 %v4204_v28 }
 0x8f3   :  { %3892 = vmatprep.mubr.msk.f32.mxu0 %vm4207_vm1, %v4204_v28 }
 0x8f4   :  { %v1887_v3 = vpop.trf.xlu1 }
 0x8f5   :  { %3886 = vmatpush3.msra.mxu1 %v1887_v3 }
 0x8f6   :  { %3888 = vmatmul.mubr.msk.f32.vlgmr.msra.gmra.mrb[20].mxu1 %vm191_vm2, %v2049_v59  ;;  %3895 = vmatprep.subr.mxu1 %v4204_v28 }
 0x8f7   :  { %3896 = vmatpush3.msra.mxu1 %v2212_v61  ;;  %3897 = vmatprep.mubr.msk.f32.mxu1 %vm4207_vm1, %v4204_v28 }
 0x8f8   :  { %v1888_v11 = vpop.trf.xlu1  ;;  %3905 = vmatprep.subr.mxu1 %v4204_v28 }
 0x8f9   :  { %3891 = vmatpush3.msra.mxu0 %v1888_v11 }
 0x8fa   :  { %3893 = vmatmul.mubr.msk.f32.vlgmr.msra.gmra.mrb[24].mxu0 %vm191_vm2, %v2123_v60  ;;  %3898 = vmatmul.mubr.msk.f32.vlgmr.msra.gmra.mrb[22].mxu1 %vm191_vm2, %v3863_v7  ;;  %v4603_v7 = vpop.trf.xlu0 }
 0x8fb   :  { %3900 = vmatprep.subr.mxu0 %v4204_v28  ;;  %3902 = vmatprep.mubr.msk.f32.mxu0 %vm4207_vm1, %v4204_v28 }
 0x8fc   :  { %3901 = vmatpush3.msra.mxu0 %v2213_v2  ;;  %3906 = vmatpush3.msra.mxu1 %v2214_v8  ;;  %v1889_v5 = vpop.trf.xlu1 }
 0x8fd   :  { %3907 = vmatprep.mubr.msk.f32.mxu1 %vm4207_vm1, %v4204_v28  ;;  %3910 = vmatprep.subr.mxu0 %v4204_v28 }
 0x8fe   :  { %3903 = vmatmul.mubr.msk.f32.vlgmr.msra.gmra.mrb[26].mxu0 %vm191_vm2, %v2302_v49  ;;  %3908 = vmatmul.mubr.msk.f32.vlgmr.msra.gmra.mrb[24].mxu1 %vm191_vm2, %v2376_v57  ;;  %v4605_v9 = vpop.trf.xlu0 }
 0x8ff   :  { %3911 = vmatpush3.msra.mxu0 %v2215_v4  ;;  %3912 = vmatprep.mubr.msk.f32.mxu0 %vm4207_vm1, %v4204_v28 }
 0x900   :  { %3915 = vmatprep.subr.mxu1 %v4204_v28  ;;  %3920 = vmatprep.subr.mxu0 %v4204_v28  ;;  %v1890_v10 = vpop.trf.xlu1 }
 0x901   :  { %3917 = vmatprep.mubr.msk.f32.mxu1 %vm4207_vm1, %v4204_v28 }
 0x902   :  { %3913 = vmatmul.mubr.msk.f32.vlgmr.msra.gmra.mrb[28].mxu0 %vm191_vm2, %v2450_v54  ;;  %v4609_v57 = vpop.trf.xlu0 }
 0x903   :  { %3922 = vmatprep.mubr.msk.f32.mxu0 %vm4207_vm1, %v4204_v28  ;;  %3916 = vmatpush3.xpose.msk.msra.mxu1 %vm191_vm2, %v1889_v5 }
 0x904   :  { %3925 = vmatprep.subr.mxu1 %v4204_v28  ;;  %v4607_v49 = vpop.trf.xlu1 }
 0x906   :  { %3921 = vmatpush3.xpose.msk.msra.mxu0 %vm191_vm2, %v1890_v10 }
 0x907   :  { %3930 = vmatprep.subr.mxu0 %v4204_v28 }
 0x908   :  { %v4611_v54 = vpop.trf.xlu1 }
 0x9c1   :  { %v1970_v13 = vpop.f32.mrb[20].mxu0 }
 0x9c2   :  { %v2523_v14 = vadd.f32 %v1970_v13, %v1861_v12  ;;  %v3879_v15 = vpop.f32.mrb[21].mxu0 }
 0x9c4   :  { %v2531_v18 = vsel %vm191_vm2, %v2523_v14, -inf }
 0x9c5   :  { %2532 = vmax.xlane.f32.xlu0 %v2531_v18  ;;  %v2044_v20 = vpop.f32.mrb[22].mxu0 }
 0x9c6   :  { %v2524_v21 = vadd.f32 %v2044_v20, %v1862_v16  ;;  %v3884_v22 = vpop.f32.mrb[23].mxu0 }
 0x9c8   :  { %v2534_v1 = vsel %vm191_vm2, %v2524_v21, -inf }
 0x9c9   :  { %2535 = vmax.xlane.f32.xlu1 %v2534_v1  ;;  %v2118_v0 = vpop.f32.mrb[20].mxu1 }
 0x9ca   :  { %v2525_v25 = vadd.f32 %v2118_v0, %v1863_v23  ;;  %v3889_v26 = vpop.f32.mrb[21].mxu1 }
 0x9cc   :  { %v2537_v37 = vsel %vm191_vm2, %v2525_v25, -inf }
 0x9cd   :  { %2538 = vmax.xlane.f32.xlu0 %v2537_v37  ;;  %v2192_v38 = vpop.f32.mrb[24].mxu0  ;;  %v2297_v34 = vpop.f32.mrb[22].mxu1 }
 0x9ce   :  { %v2526_v39 = vadd.f32 %v2192_v38, %v1864_v29  ;;  %v2527_v40 = vadd.f32 %v2297_v34, %v1865_v30  ;;  %v3894_v41 = vpop.f32.mrb[25].mxu0  ;;  %v3899_v42 = vpop.f32.mrb[23].mxu1 }
 0x9d0   :  { %v2543_v44 = vsel %vm191_vm2, %v2527_v40, -inf  ;;  %v2540_v45 = vsel %vm191_vm2, %v2526_v39, -inf }
 0x9d1   :  { %2544 = vmax.xlane.f32.xlu0 %v2543_v44  ;;  %v2445_v31 = vpop.f32.mrb[24].mxu1  ;;  %2541 = vmax.xlane.f32.xlu1 %v2540_v45  ;;  %v2371_v46 = vpop.f32.mrb[26].mxu0 }
 0x9d2   :  { %v2529_v32 = vadd.f32 %v2445_v31, %v1867_v36  ;;  %v2528_v33 = vadd.f32 %v2371_v46, %v1866_v43  ;;  %v3904_v47 = vpop.f32.mrb[27].mxu0  ;;  %v3909_v48 = vpop.f32.mrb[25].mxu1 }
 0x9d4   :  { %v2549_v51 = vsel %vm191_vm2, %v2529_v32, -inf  ;;  %v2546_v35 = vsel %vm191_vm2, %v2528_v33, -inf }
 0x9d5   :  { %2550 = vmax.xlane.f32.xlu0 %v2549_v51  ;;  %2547 = vmax.xlane.f32.xlu1 %v2546_v35  ;;  %v2519_v52 = vpop.f32.mrb[28].mxu0 }
 0x9d6   :  { %v2530_v53 = vadd.f32 %v2519_v52, %v1868_v50  ;;  %v3914_v55 = vpop.f32.mrb[29].mxu0 }
 0x9d8   :  { %v2552_v56 = vsel %vm191_vm2, %v2530_v53, -inf }
 0x9d9   :  { %2553 = vmax.xlane.f32.xlu1 %v2552_v56 }
 0xa52   :  { %v2533_v58 = vpop.xlane.xlu0 %2532 }
 0xa53   :  { %v2555_v59 = vsub.f32 %v2523_v14, %v2533_v58 }
 0xa55   :  { %v2563_v60 = vmul.f32 1.442695, %v2555_v59 }
 0xa56   :  { %v2536_v61 = vpop.xlane.xlu1 %2535 }
 0xa57   :  { %4142 = vpow2.f32 %v2563_v60  ;;  %v2556_v62 = vsub.f32 %v2524_v21, %v2536_v61 }
 0xa59   :  { %v2565_v63 = vmul.f32 1.442695, %v2556_v62 }
 0xa5a   :  { %v2539_v2 = vpop.xlane.xlu0 %2538 }
 0xa5b   :  { %4144 = vpow2.f32 %v2565_v63  ;;  %v2557_v3 = vsub.f32 %v2525_v25, %v2539_v2 }
 0xa5d   :  { %v2567_v8 = vmul.f32 1.442695, %v2557_v3 }
 0xa5e   :  { %v2545_v11 = vpop.xlane.xlu0 %2544  ;;  %v2542_v4 = vpop.xlane.xlu1 %2541 }
 0xa5f   :  { %4146 = vpow2.f32 %v2567_v8  ;;  %v2559_v5 = vsub.f32 %v2527_v40, %v2545_v11  ;;  %v2558_v10 = vsub.f32 %v2526_v39, %v2542_v4 }
 0xa61   :  { %v4143_v12 = vpop.eup %4142  ;;  %v2571_v13 = vmul.f32 1.442695, %v2559_v5  ;;  %v2569_v15 = vmul.f32 1.442695, %v2558_v10 }
 0xa62   :  { %v2551_v16 = vpop.xlane.xlu0 %2550  ;;  %v2548_v18 = vpop.xlane.xlu1 %2547  ;;  %v2579_v14 = vsel %vm191_vm2, %v4143_v12, 0.0 }
 0xa63   :  { %4148 = vpow2.f32 %v2571_v13  ;;  %v2561_v20 = vsub.f32 %v2529_v32, %v2551_v16  ;;  %v2560_v21 = vsub.f32 %v2528_v33, %v2548_v18  ;;  %2580 = vadd.xlane.f32.xlu0 %v2579_v14 }
 0xa64   :  { %4150 = vpow2.f32 %v2569_v15 }
 0xa65   :  { %v4145_v22 = vpop.eup %4144  ;;  %v2575_v23 = vmul.f32 1.442695, %v2561_v20  ;;  %v2573_v1 = vmul.f32 1.442695, %v2560_v21 }
 0xa66   :  { %v2554_v0 = vpop.xlane.xlu1 %2553  ;;  %v2582_v25 = vsel %vm191_vm2, %v4145_v22, 0.0 }
 0xa67   :  { %4152 = vpow2.f32 %v2575_v23  ;;  %v2562_v26 = vsub.f32 %v2530_v53, %v2554_v0  ;;  %2583 = vadd.xlane.f32.xlu1 %v2582_v25 }
 0xa68   :  { %4154 = vpow2.f32 %v2573_v1 }
 0xa69   :  { %v4147_v29 = vpop.eup %4146  ;;  %v2577_v30 = vmul.f32 1.442695, %v2562_v26 }
 0xa6a   :  { %v2585_v37 = vsel %vm191_vm2, %v4147_v29, 0.0 }
 0xa6b   :  { %4156 = vpow2.f32 %v2577_v30  ;;  %2586 = vadd.xlane.f32.xlu0 %v2585_v37 }
 0xa6d   :  { %v4149_v38 = vpop.eup %4148 }
 0xa6e   :  { %v4151_v34 = vpop.eup %4150  ;;  %v2591_v39 = vsel %vm191_vm2, %v4149_v38, 0.0 }
 0xa6f   :  { %2592 = vadd.xlane.f32.xlu0 %v2591_v39  ;;  %v2588_v40 = vsel %vm191_vm2, %v4151_v34, 0.0 }
 0xa70   :  { %2589 = vadd.xlane.f32.xlu1 %v2588_v40 }
 0xa71   :  { %v4153_v41 = vpop.eup %4152 }
 0xa72   :  { %v4155_v42 = vpop.eup %4154  ;;  %v2597_v36 = vsel %vm191_vm2, %v4153_v41, 0.0 }
 0xa73   :  { %2598 = vadd.xlane.f32.xlu0 %v2597_v36  ;;  %v2594_v43 = vsel %vm191_vm2, %v4155_v42, 0.0 }
 0xa74   :  { %2595 = vadd.xlane.f32.xlu1 %v2594_v43 }
 0xa75   :  { %v4157_v44 = vpop.eup %4156 }
 0xa76   :  { %v2600_v45 = vsel %vm191_vm2, %v4157_v44, 0.0 }
 0xa78   :  { %2601 = vadd.xlane.f32.xlu1 %v2600_v45 }
 0xa89   :  { %4093 = vrot.lane.b32.xlu0 %v4500_v27, %s4208_s2 }
 0xaf0   :  { %v2581_v31 = vpop.xlane.xlu0 %2580 }
 0xaf1   :  { %4158 = vrcp.f32 %v2581_v31 }
 0xaf4   :  { %v2584_v46 = vpop.xlane.xlu1 %2583 }
 0xaf5   :  { %4160 = vrcp.f32 %v2584_v46 }
 0xaf8   :  { %v2587_v32 = vpop.xlane.xlu0 %2586 }
 0xaf9   :  { %4162 = vrcp.f32 %v2587_v32  ;;  %v3381_v32 = vld [vmem:[%s4756_s7 + $0x10] sm:$0xff] }
 0xafb   :  { %v4159_v33 = vpop.eup %4158 }
 0xafc   :  { %v2611_v47 = vmul.f32 %v4159_v33, %v4143_v12  ;;  %v2593_v48 = vpop.xlane.xlu0 %2592 }
 0xafd   :  { %4164 = vrcp.f32 %v2593_v48  ;;  %v2590_v50 = vpop.xlane.xlu1 %2589 }
 0xafe   :  { %4166 = vrcp.f32 %v2590_v50  ;;  %3918 = vmatmul.mubr.msk.f32.vlgmr.msra.gmra.mrb[26].mxu1 %vm191_vm2, %v2611_v47  ;;  %v3382_v47 = vld [vmem:[%s4756_s7 + $0x18] sm:$0xff]  ;;  %v3466_v50 = vld [vmem:[%s4757_s8] sm:$0xff] }
 0xaff   :  { %v4161_v51 = vpop.eup %4160  ;;  %3926 = vmatpush3.xpose.msk.msra.mxu1 %vm191_vm2, %v4607_v49  ;;  %3927 = vmatprep.mubr.msk.f32.mxu1 %vm4207_vm1, %v4204_v28  ;;  %v4040_v48 = vpack.c.bf16 %v3382_v47, %v3381_v32 }
 0xb00   :  { %v2612_v35 = vmul.f32 %v4161_v51, %v4145_v22  ;;  %v2599_v52 = vpop.xlane.xlu0 %2598  ;;  %3935 = vmatprep.subr.mxu1 %v4204_v28  ;;  %v3467_v51 = vld [vmem:[%s4757_s8 + $0x8] sm:$0xff] }
 0xb01   :  { %4168 = vrcp.f32 %v2599_v52  ;;  %v2596_v53 = vpop.xlane.xlu1 %2595  ;;  %v4044_v52 = vpack.c.bf16 %v3467_v51, %v3466_v50 }
 0xb02   :  { %4170 = vrcp.f32 %v2596_v53  ;;  %3923 = vmatmul.mubr.msk.f32.vlgmr.msra.gmra.mrb[30].mxu0 %vm191_vm2, %v2612_v35  ;;  %v3468_v35 = vld [vmem:[%s4757_s8 + $0x10] sm:$0xff]  ;;  %v3469_v53 = vld [vmem:[%s4757_s8 + $0x18] sm:$0xff] }
 0xb03   :  { %v4163_v55 = vpop.eup %4162  ;;  %3931 = vmatpush3.xpose.msk.msra.mxu0 %vm191_vm2, %v4611_v54  ;;  %3932 = vmatprep.mubr.msk.f32.mxu0 %vm4207_vm1, %v4204_v28 }
 0xb04   :  { %v2613_v56 = vmul.f32 %v4163_v55, %v4147_v29  ;;  %3940 = vmatprep.subr.mxu0 %v4204_v28  ;;  %v4048_v55 = vpack.c.bf16 %v3469_v53, %v3468_v35 }
 0xb05   :  { %v2602_v49 = vpop.xlane.xlu1 %2601 }
 0xb06   :  { %4172 = vrcp.f32 %v2602_v49  ;;  %3928 = vmatmul.mubr.msk.f32.vlgmr.msra.gmra.mrb[28].mxu1 %vm191_vm2, %v2613_v56  ;;  %v3470_v56 = vld [vmem:[%s4757_s8 + $0x20] sm:$0xff]  ;;  %v3471_v49 = vld [vmem:[%s4757_s8 + $0x28] sm:$0xff] }
 0xb07   :  { %v4165_v58 = vpop.eup %4164  ;;  %3936 = vmatpush3.xpose.msk.msra.mxu1 %vm191_vm2, %v4601_v6  ;;  %3937 = vmatprep.mubr.msk.f32.mxu1 %vm4207_vm1, %v4204_v28 }
 0xb08   :  { %v4167_v59 = vpop.eup %4166  ;;  %v2615_v60 = vmul.f32 %v4165_v58, %v4149_v38  ;;  %3945 = vmatprep.subr.mxu1 %v4204_v28  ;;  %v4052_v58 = vpack.c.bf16 %v3471_v49, %v3470_v56 }
 0xb09   :  { %v2614_v54 = vmul.f32 %v4167_v59, %v4151_v34 }
 0xb0a   :  { %3938 = vmatmul.mubr.msk.f32.vlgmr.msra.gmra.mrb[30].mxu1 %vm191_vm2, %v2615_v60 }
 0xb0b   :  { %v4169_v61 = vpop.eup %4168  ;;  %3933 = vmatmul.mubr.msk.f32.vlgmr.msra.gmra.mrb[32].mxu0 %vm191_vm2, %v2614_v54  ;;  %3946 = vmatpush3.xpose.msk.msra.mxu1 %vm191_vm2, %v4605_v9  ;;  %v4094_v9 = vpop.permute.xlu0 %4093 }
 0xb0c   :  { %v4171_v62 = vpop.eup %4170  ;;  %v2617_v63 = vmul.f32 %v4169_v61, %v4153_v41  ;;  %3941 = vmatpush3.xpose.msk.msra.mxu0 %vm191_vm2, %v4603_v7  ;;  %3942 = vmatprep.mubr.msk.f32.mxu0 %vm4207_vm1, %v4204_v28  ;;  %v4096_v3 = vunpack.i.h.bf16 %v4094_v9  ;;  %v4095_v8 = vunpack.i.l.bf16 %v4094_v9 }
 0xb0d   :  { %v2616_v6 = vmul.f32 %v4171_v62, %v4155_v42  ;;  %3947 = vmatprep.mubr.msk.f32.mxu1 %vm4207_vm1, %v4204_v28  ;;  %3950 = vmatprep.subr.mxu0 %v4204_v28 }
 0xb0e   :  { %3948 = vmatmul.mubr.msk.f32.vlgmr.msra.gmra.mrb[32].mxu1 %vm191_vm2, %v2617_v63  ;;  %v4028_v11 = vpack.c.bf16 %v4096_v3, %v4095_v8 }
 0xb0f   :  { %3943 = vmatmul.mubr.msk.f32.vlgmr.msra.gmra.mrb[34].mxu0 %vm191_vm2, %v2616_v6 }
 0xb10   :  { %v4173_v2 = vpop.eup %4172  ;;  %3951 = vmatpush3.xpose.msk.msra.mxu0 %vm191_vm2, %v4609_v57  ;;  %3952 = vmatprep.mubr.msk.f32.mxu0 %vm4207_vm1, %v4204_v28 }
 0xb11   :  { %v2618_v7 = vmul.f32 %v4173_v2, %v4157_v44  ;;  %4029 = vmatprep.subr.bf16.mxu1 %v4028_v11 }
 0xb12   :  { %4031 = vmatpush3.bf16.msra.mxu1 %v4028_v11 }
 0xb13   :  { %3953 = vmatmul.mubr.msk.f32.vlgmr.msra.gmra.mrb[36].mxu0 %vm191_vm2, %v2618_v7  ;;  %v3636_v7 = vld [vmem:[%s4753_s4 + $0x2] ss:$0 sm:$0xff]  ;;  %s4212_s4 = smov [#allocation3]  }
 0xb14   :  { %s3565_s11 = sshll.u32 %s4212_s4, 4  ;;  %s3566_s11 = int_to_ptr.vmem [resolvable:$true] %s3565_s11 }
 0xb15   :  { %p4183_p1 = scmp.lt.s32.totalorder %s3566_s11, %s3566_s11 }
 0xbd1   :  { %v2691_v4 = vpop.f32.mrb[26].mxu1 }
 0xbd2   :  { %2695 = vst.msk [vmem:[#allocation2] sm:$0xff] %vm191_vm2, %v2691_v4  ;;  %v3919_v5 = vpop.f32.mrb[27].mxu1  ;;  %v3472_v4 = vld [vmem:[%s4757_s8 + $0x30] sm:$0xff] }
 0xbd3   :  { %v3473_v5 = vld [vmem:[%s4757_s8 + $0x38] sm:$0xff]  ;;  %s4178_s8 = scalar_lea.vmem %s3566_s11, 256 }
 0xbd4   :  { %p4179_p0 = scmp.ne.s32.totalorder %s3566_s11, %s4178_s8  ;;  %p4184_p2 = scmp.lt.s32.totalorder %s4178_s8, %s4178_s8 }
 0xbd5   :  { %v2768_v57 = vpop.f32.mrb[30].mxu0 }
 0xbd6   :  { %2773 = vrot.lane.b32.xlu0 %v2768_v57, %s4209_s19  ;;  %v3924_v28 = vpop.f32.mrb[31].mxu0  ;;  %v4056_v57 = vpack.c.bf16 %v3473_v5, %v3472_v4  ;;  %p4185_p3 = por %p4184_p2, %p4183_p1 }
 0xbd8   :  { %p4186_p4 = pnand %p4185_p3, %p4179_p0 }
 0xbd9   :  { %v2849_v10 = vpop.f32.mrb[28].mxu1 }
 0xbda   :  { %v3929_v12 = vpop.f32.mrb[29].mxu1  ;;  %2854 = vrot.lane.b32.xlu1 %v2849_v10, %s4210_s20 }
 0xbdd   :  { %v3011_v13 = vpop.f32.mrb[30].mxu1 }
 0xbde   :  { %v2930_v27 = vpop.f32.mrb[32].mxu0  ;;  %3015 = vst.msk [vmem:[#allocation2 + $0x8] sm:$0xff] %vm191_vm2, %v3011_v13  ;;  %v3939_v15 = vpop.f32.mrb[31].mxu1 }
 0xbdf   :  { %2935 = vrot.lane.b32.xlu1 %v2930_v27, %s4211_s21  ;;  %v3934_v16 = vpop.f32.mrb[33].mxu0 }
 0xbe1   :  { %v3169_v18 = vpop.f32.mrb[32].mxu1 }
 0xbe2   :  { %v3088_v14 = vpop.f32.mrb[34].mxu0  ;;  %v3949_v20 = vpop.f32.mrb[33].mxu1  ;;  %3174 = vrot.lane.b32.xlu0 %v3169_v18, %s4210_s20 }
 0xbe3   :  { %3093 = vrot.lane.b32.xlu1 %v3088_v14, %s4209_s19  ;;  %v3944_v21 = vpop.f32.mrb[35].mxu0 }
 0xbe6   :  { %v3250_v22 = vpop.f32.mrb[36].mxu0  ;;  %4098 = vrot.lane.b32.xlu0 %v4492_v24, %s4208_s2 }
 0xbe7   :  { %3255 = vrot.lane.b32.xlu1 %v3250_v22, %s4211_s21  ;;  %v3954_v23 = vpop.f32.mrb[37].mxu0 }
 0xc48   :  { %v2774_v1 = vpop.permute.xlu0 %2773 }
 0xc49   :  { %2776 = vst.msk [vmem:[#allocation2] sm:$0xff] %vm1069_vm3, %v2774_v1 }
 0xc4c   :  { %v2855_v0 = vpop.permute.xlu1 %2854 }
 0xc4d   :  { %2857 = vst.msk [vmem:[#allocation2] sm:$0xff] %vm1151_vm4, %v2855_v0 }
 0xc51   :  { %v2936_v25 = vpop.permute.xlu1 %2935 }
 0xc52   :  { %2938 = vst.msk [vmem:[#allocation2] sm:$0xff] %vm1233_vm5, %v2936_v25 }
 0xc54   :  { %v3175_v26 = vpop.permute.xlu0 %3174 }
 0xc55   :  { %v3094_v29 = vpop.permute.xlu1 %3093 }
 0xc56   :  { %3096 = vst.msk [vmem:[#allocation2 + $0x8] sm:$0xff] %vm1069_vm3, %v3094_v29 }
 0xc57   :  { %3177 = vst.msk [vmem:[#allocation2 + $0x8] sm:$0xff] %vm1151_vm4, %v3175_v26 }
 0xc58   :  { %v4099_v30 = vpop.permute.xlu0 %4098 }
 0xc59   :  { %v4101_v24 = vunpack.i.h.bf16 %v4099_v30  ;;  %v4100_v37 = vunpack.i.l.bf16 %v4099_v30  ;;  %v3256_v38 = vpop.permute.xlu1 %3255  ;;  %v3259_v34 = vld [vmem:[#allocation2] sm:$0xff] }
 0xc5a   :  { %3258 = vst.msk [vmem:[#allocation2 + $0x8] sm:$0xff] %vm1233_vm5, %v3256_v38  ;;  %3963 = vmatprep.mubr.msk.f32.mxu1 %vm40_vm0, %v3259_v34 }
 0xc5b   :  { %v4032_v39 = vpack.c.bf16 %v4101_v24, %v4100_v37 }
 0xc5d   :  { %4033 = vmatprep.subr.bf16.mxu1 %v4032_v39 }
 0xc5e   :  { %4035 = vmatpush3.bf16.msra.mxu1 %v4032_v39 }
 0xc5f   :  { %4045 = vmatprep.subr.bf16.mxu1 %v4044_v52 }
 0xc61   :  { %v3260_v40 = vld [vmem:[#allocation2 + $0x8] sm:$0xff] }
 0xc62   :  { %3964 = vmatmul.mubr.msk.f32.vlgmr.msra.gmra.mrb[34].mxu1 %vm40_vm0, %v3260_v40 }
 0xc63   :  { %4047 = vmatpush3.bf16.msra.mxu1 %v4044_v52 }
 0xc64   :  { %4049 = vmatprep.subr.bf16.mxu1 %v4048_v55 }
 0xc67   :  { %4051 = vmatpush3.bf16.msra.mxu1 %v4048_v55 }
 0xc68   :  { %4053 = vmatprep.subr.bf16.mxu1 %v4052_v58 }
 0xc6b   :  { %4055 = vmatpush3.bf16.msra.mxu1 %v4052_v58 }
 0xc6c   :  { %4057 = vmatprep.subr.bf16.mxu1 %v4056_v57 }
 0xc6f   :  { %4059 = vmatpush3.bf16.msra.mxu1 %v4056_v57 }
 0xd35   :  { %v3965_v41 = vpop.f32.mrb[34].mxu1 }
 0xd36   :  { %v4678_v42 = vadd.f32 %v3965_v41, %v4475_v17  ;;  %v3345_v36 = vpop.f32.mrb[35].mxu1  ;;  %v3379_v17 = vld [vmem:[%s4756_s7] sm:$0xff] }
 0xd37   :  { %v4681_v43 = vadd.f32 %v3345_v36, %v4478_v19  ;;  %v3380_v19 = vld [vmem:[%s4756_s7 + $0x8] sm:$0xff] }
 0xd38   :  { %v3358_v44 = vmul.f32 %v4678_v42, %v4678_v42  ;;  %v4036_v33 = vpack.c.bf16 %v3380_v19, %v3379_v17 }
 0xd39   :  { %v3357_v45 = vmul.f32 %v4681_v43, %v4681_v43 }
 0xd3a   :  { %v3362_v31 = vsel %vm40_vm0, %v3358_v44, 0.0  ;;  %4037 = vmatprep.subr.bf16.mxu0 %v4036_v33 }
 0xd3b   :  { %3363 = vadd.xlane.f32.xlu0 %v3362_v31  ;;  %v3359_v46 = vsel %vm40_vm0, %v3357_v45, 0.0  ;;  %4039 = vmatpush3.bf16.msra.mxu0 %v4036_v33 }
 0xd3c   :  { %3360 = vadd.xlane.f32.xlu1 %v3359_v46  ;;  %4041 = vmatprep.subr.bf16.mxu0 %v4040_v48 }
 0xd3f   :  { %4043 = vmatpush3.bf16.msra.mxu0 %v4040_v48 }
 0xdc8   :  { %v3364_v59 = vpop.xlane.xlu0 %3363 }
 0xdc9   :  { %v3366_v60 = vmul.f32 0.03125, %v3364_v59  ;;  %v3361_v54 = vpop.xlane.xlu1 %3360 }
 0xdca   :  { %v3365_v61 = vmul.f32 0.03125, %v3361_v54 }
 0xdcb   :  { %v3368_v62 = vadd.f32 1e-06, %v3366_v60 }
 0xdcc   :  { %v3367_v63 = vadd.f32 1e-06, %v3365_v61 }
 0xdcd   :  { %4174 = vrsqrt.f32 %v3368_v62 }
 0xdce   :  { %4176 = vrsqrt.f32 %v3367_v63 }
 0xdd7   :  { %v4175_v6 = vpop.eup %4174 }
 0xdd8   :  { %v4177_v2 = vpop.eup %4176  ;;  %v3372_v9 = vmul.f32 %v4175_v6, %v4678_v42 }
 0xdd9   :  { %v3371_v3 = vmul.f32 %v4177_v2, %v4681_v43 }
 0xdda   :  { %v3378_v11 = vmul.f32 %v3636_v7, %v3372_v9 }
 0xddb   :  { %v3377_v8 = vmul.f32 %v3636_v7, %v3371_v3 }
 0xddd   :  { %3974 = vmatprep.mubr.msk.f32.mxu0 %vm40_vm0, %v3377_v8 }
 0xdde   :  { %3975 = vmatmul.mubr.msk.f32.vlgmr.msra.gmra.mrb[38].mxu0 %vm40_vm0, %v3378_v11 }
 0xeb1   :  { %v3976_v28 = vpop.f32.mrb[38].mxu0 }
 0xeb2   :  { %v3455_v10 = vpop.f32.mrb[39].mxu0  ;;  %v3465_v13 = vmax.f32 %v3976_v28, 0.0 }
 0xeb3   :  { %v3464_v12 = vmax.f32 %v3455_v10, 0.0 }
 0xeb5   :  { %3993 = vmatprep.mubr.msk.f32.mxu1 %vm3474_vm6, %v3464_v12 }
 0xeb6   :  { %3994 = vmatmul.mubr.msk.f32.vlgmr.msra.gmra.mrb[36].mxu1 %vm3474_vm6, %v3465_v13 }
 0xf89   :  { %v3995_v27 = vpop.f32.mrb[36].mxu1 }
 0xf8a   :  { %v3557_v15 = vadd.f32 %v3995_v27, %v4678_v42  ;;  %v3547_v16 = vpop.f32.mrb[37].mxu1 }
 0xf8b   :  { %v3556_v18 = vadd.f32 %v3547_v16, %v4681_v43 }
 0xf8c   :  { %3559 = vst.msk [vmem:[#allocation3 + $0x8] sm:$0xff] %vm40_vm0, %v3557_v15 }
 0xf8d   :  { %3558 = vst.msk [vmem:[#allocation3] sm:$0xff] %vm40_vm0, %v3556_v18 }
 0xf8e   :  { %4189 = shalt.err (!%p4186_p4)
}
 0xf8f   :  { %s4190_s20 = scalar_lea.hbm %s4758_s9, 256 }
 0xf90   :  { %p4191_p5 = scmp.ne.s32.totalorder %s4758_s9, %s4190_s20  ;;  %p4194_p6 = scmp.lt.u32.totalorder %s4190_s20, %s4758_s9 }
 0xf92   :  { %p4196_p7 = pnand %p4194_p6, %p4191_p5 }
 0xf94   :  { %4199 = shalt.err (!%p4196_p7)
}
 0xf95   :  { %s4213_s5 = smov 128  }
 0xf96   :  { %3571 = dma.vmem_to_hbm [thread:$0]  %s3566_s11, 256, %s4758_s9, [#allocation4], %s4213_s5, %s4213_s5, %s4209_s19  }
 0xf97   :  { %4200 = dma.done.wait [#allocation4], 256  }
 0xf98   :  { %4201 = vsyncadd [#allocation4], 4294967040 }
 0xf99   :  { %3575 = vsyncpa [#allocation4], 1 }

</bundles_post_ra>
